<compile_context>
chip_gen: v5e
topology: v5e:2x2
jax: 0.10.0
libtpu: 0.0.40
codegen_flags: <defaults>
</compile_context>

<pallas_src>
import jax
import jax.numpy as jnp
from jax.experimental import pallas as pl
from jax.experimental.pallas import tpu as pltpu  # noqa: F401  (TPU backend)


def _whole_block(shape):
    """BlockSpec covering the full array (used with grid=(1,))."""
    n = len(shape)
    return pl.BlockSpec(shape, lambda i, _n=n: (0,) * _n)


# ----------------------------------------------------------------------------
# Pallas kernels
# ----------------------------------------------------------------------------
def _conv_relu_pool_kernel(p_ref, w_ref, b_ref, o_ref):
    """Fused valid 5x5 conv + bias + ReLU + 2x2/stride-2 max pool.

    p_ref : (4, K, M)  transposed im2col patches, one slab per pool corner.
                       K = kh*kw*Cin, M = B*Hp*Wp  (lane axis, lane-dense).
    w_ref : (Cout, K)  conv weight, channel-major.
    b_ref : (Cout, 1)  bias.
    o_ref : (Cout, M)  pooled activations, channel-major.

    max-pool commutes with the monotone ReLU and the per-channel bias, so the
    kernel maxes the four corner matmuls first, then applies bias + ReLU once.
    """
    w = w_ref[...]
    acc = jnp.dot(w, p_ref[0], preferred_element_type=jnp.float32)
    for c in range(1, 4):
        acc = jnp.maximum(
            acc, jnp.dot(w, p_ref[c], preferred_element_type=jnp.float32)
        )
    o_ref[...] = jnp.maximum(acc + b_ref[...], 0.0).astype(o_ref.dtype)


def _mlp_kernel(x_ref, w1_ref, b1_ref, w2_ref, b2_ref, w3_ref, b3_ref, o_ref):
    """fc1 + ReLU -> fc2 + ReLU -> fc3 chained inside a single kernel.

    All weights stay resident in VMEM; the (B,120)/(B,84) intermediates never
    leave the kernel.
    """
    h = jnp.dot(x_ref[...], w1_ref[...], preferred_element_type=jnp.float32)
    h = jnp.maximum(h + b1_ref[...], 0.0)
    h = jnp.dot(h, w2_ref[...], preferred_element_type=jnp.float32)
    h = jnp.maximum(h + b2_ref[...], 0.0)
    h = jnp.dot(h, w3_ref[...], preferred_element_type=jnp.float32)
    o_ref[...] = (h + b3_ref[...]).astype(o_ref.dtype)


# ----------------------------------------------------------------------------
# Wrappers calling pallas_call
# ----------------------------------------------------------------------------
def conv2d_relu_pool(x_nhwc, w_oihw, b, *, ksize=5):
    """Valid conv (stride 1) + bias + ReLU + 2x2 max-pool, fused in one kernel.

    Returns (out, (B, Hp, Wp)) with out of shape (Cout, B*Hp*Wp), channel-major,
    columns ordered (b, hp, wp).
    """
    B, H, W, Cin = x_nhwc.shape
    Cout = w_oihw.shape[0]
    Ho, Wo = H - ksize + 1, W - ksize + 1
    assert Ho % 2 == 0 and Wo % 2 == 0, "2x2 pool expects even conv output dims"
    Hp, Wp = Ho // 2, Wo // 2
    M = B * Hp * Wp
    K = ksize * ksize * Cin

    # im2col grouped by 2x2 pool corner (dh, dw); patch axis ordered (kh, kw, ci)
    # to match the (2, 3, 1, 0) weight transpose.  XLA-side glue only.
    corners = []
    for dh in (0, 1):
        for dw in (0, 1):
            slabs = [
                x_nhwc[:, dh + kh: dh + kh + 2 * Hp: 2,
                       dw + kw: dw + kw + 2 * Wp: 2, :]
                for kh in range(ksize)
                for kw in range(ksize)
            ]
            p = jnp.stack(slabs, axis=3)          # (B, Hp, Wp, k*k, Cin)
            corners.append(p.reshape(M, K))
    p4 = jnp.stack(corners, axis=0)               # (4, M, K)
    p4_t = jnp.transpose(p4, (0, 2, 1))           # (4, K, M)  -> lane-dense M

    # PyTorch weight (Cout, Cin, kh, kw) -> (K, Cout) -> transposed (Cout, K)
    w_t = jnp.transpose(w_oihw, (2, 3, 1, 0)).reshape(K, Cout).T
    b2 = b.reshape(Cout, 1).astype(jnp.float32)

    out = pl.pallas_call(
        _conv_relu_pool_kernel,
        out_shape=jax.ShapeDtypeStruct((Cout, M), jnp.float32),
        grid=(1,),
        in_specs=[
            _whole_block((4, K, M)),
            _whole_block((Cout, K)),
            _whole_block((Cout, 1)),
        ],
        out_specs=_whole_block((Cout, M)),
    )(p4_t.astype(jnp.float32), w_t.astype(jnp.float32), b2)
    return out, (B, Hp, Wp)


def mlp3(x, w1, b1, w2, b2, w3, b3):
    """Fused fc1(ReLU) -> fc2(ReLU) -> fc3.  x: (B, D0); wi: (Di-1, Di)."""
    B, D0 = x.shape
    D1 = w1.shape[1]
    D2 = w2.shape[1]
    D3 = w3.shape[1]
    return pl.pallas_call(
        _mlp_kernel,
        out_shape=jax.ShapeDtypeStruct((B, D3), jnp.float32),
        grid=(1,),
        in_specs=[
            _whole_block((B, D0)),
            _whole_block((D0, D1)), _whole_block((1, D1)),
            _whole_block((D1, D2)), _whole_block((1, D2)),
            _whole_block((D2, D3)), _whole_block((1, D3)),
        ],
        out_specs=_whole_block((B, D3)),
    )(
        x.astype(jnp.float32),
        w1.astype(jnp.float32), b1.reshape(1, D1).astype(jnp.float32),
        w2.astype(jnp.float32), b2.reshape(1, D2).astype(jnp.float32),
        w3.astype(jnp.float32), b3.reshape(1, D3).astype(jnp.float32),
    )


# ----------------------------------------------------------------------------
# Full forward pass (semantics of Net.forward)
# ----------------------------------------------------------------------------
def net_forward(x_nchw, params):
    # NCHW (PyTorch) -> NHWC (internal)
    x = jnp.transpose(x_nchw, (0, 2, 3, 1)).astype(jnp.float32)

    # conv1 + ReLU + 2x2 pool (one kernel) -> (6, B*14*14) channel-major
    y1, (B, H1, W1) = conv2d_relu_pool(x, params["conv1_w"], params["conv1_b"])
    # channel-major -> NHWC for the next layer's im2col (tiny XLA glue)
    x1 = jnp.transpose(y1.reshape(6, B, H1, W1), (1, 2, 3, 0))    # (B,14,14,6)

    # conv2 + ReLU + 2x2 pool (one kernel) -> (16, B*5*5) channel-major
    y2, (B, H2, W2) = conv2d_relu_pool(x1, params["conv2_w"], params["conv2_b"])
    # channel-major already matches PyTorch's NCHW x.view(-1, 16*5*5) flatten
    x2 = jnp.transpose(y2.reshape(16, B, H2, W2), (1, 0, 2, 3)).reshape(
        B, 16 * H2 * W2
    )

    # fc1 -> ReLU -> fc2 -> ReLU -> fc3 fused into one kernel
    return mlp3(
        x2,
        params["fc1_w"].T, params["fc1_b"],
        params["fc2_w"].T, params["fc2_b"],
        params["fc3_w"].T, params["fc3_b"],
    )


# ----------------------------------------------------------------------------
# Deterministic parameter init (PyTorch-style uniform(-1/sqrt(fan_in), +...))
# ----------------------------------------------------------------------------
def init_params(key):
    def uni(k, shape, fan_in):
        bound = 1.0 / jnp.sqrt(jnp.float32(fan_in))
        return jax.random.uniform(
            k, shape, dtype=jnp.float32, minval=-bound, maxval=bound
        )

    ks = jax.random.split(key, 10)
    return {
        "conv1_w": uni(ks[0], (6, 3, 5, 5), 3 * 5 * 5),
        "conv1_b": uni(ks[1], (6,), 3 * 5 * 5),
        "conv2_w": uni(ks[2], (16, 6, 5, 5), 6 * 5 * 5),
        "conv2_b": uni(ks[3], (16,), 6 * 5 * 5),
        "fc1_w": uni(ks[4], (120, 400), 400),
        "fc1_b": uni(ks[5], (120,), 400),
        "fc2_w": uni(ks[6], (84, 120), 120),
        "fc2_b": uni(ks[7], (84,), 120),
        "fc3_w": uni(ks[8], (10, 84), 84),
        "fc3_b": uni(ks[9], (10,), 84),
    }


if __name__ == "__main__":
    key = jax.random.PRNGKey(0)
    k_param, k_x = jax.random.split(key)
    params = init_params(k_param)
    # CIFAR10-shaped input: the fc1 dimension (16*5*5) forces 32x32 spatial.
    x = jax.random.normal(k_x, (2, 3, 32, 32), dtype=jnp.float32)

    out = jax.jit(net_forward)(x, params)
    out = jax.block_until_ready(out)
    assert out.shape == (2, 10) and out.dtype == jnp.float32
    assert bool(jnp.all(jnp.isfinite(out)))
    print("KERNEL_OK")
</pallas_src>

<mosaic_0001>
module attributes {stable_mosaic.version = 11 : i64} {
  func.func @_conv_relu_pool_kernel(%arg0: i32, %arg1: memref<4x75x392xf32, #tpu.memory_space<vmem>>, %arg2: memref<6x75xf32, #tpu.memory_space<vmem>>, %arg3: memref<6x1xf32, #tpu.memory_space<vmem>>, %arg4: memref<6x392xf32, #tpu.memory_space<vmem>>) attributes {dimension_semantics = [#tpu.dimension_semantics<arbitrary>], iteration_bounds = array<i64: 1>, scalar_prefetch = 0 : i64, scratch_operands = 0 : i64, tpu.core_type = #tpu.core_type<tc>, window_params = [{pipeline_mode = #tpu.pipeline_mode<synchronous>, transform_indices = @transform_0, window_bounds = array<i64: 4, 75, 392>}, {pipeline_mode = #tpu.pipeline_mode<synchronous>, transform_indices = @transform_1, window_bounds = array<i64: 6, 75>}, {pipeline_mode = #tpu.pipeline_mode<synchronous>, transform_indices = @transform_2, window_bounds = array<i64: 6, 1>}, {pipeline_mode = #tpu.pipeline_mode<synchronous>, transform_indices = @transform_3, window_bounds = array<i64: 6, 392>}]} {
    %c0 = arith.constant 0 : index
    %c0_0 = arith.constant 0 : index
    %0 = vector.load %arg2[%c0, %c0_0] : memref<6x75xf32, #tpu.memory_space<vmem>>, vector<6x75xf32>
    %c0_1 = arith.constant 0 : index
    %c0_2 = arith.constant 0 : index
    %c0_3 = arith.constant 0 : index
    %1 = vector.load %arg1[%c0_1, %c0_2, %c0_3] : memref<4x75x392xf32, #tpu.memory_space<vmem>>, vector<1x75x392xf32>
    %2 = vector.shape_cast %1 : vector<1x75x392xf32> to vector<75x392xf32>
    %cst = arith.constant dense<0.000000e+00> : vector<6x392xf32>
    %3 = tpu.matmul %0, %2, %cst {dimension_numbers = #tpu.dot_dimension_numbers<[1], [0], [0], [1], [0, 0, 1, 1], [], []>} : vector<6x75xf32>, vector<75x392xf32>, vector<6x392xf32> -> vector<6x392xf32>
    %c1 = arith.constant 1 : index
    %c0_4 = arith.constant 0 : index
    %c0_5 = arith.constant 0 : index
    %4 = vector.load %arg1[%c1, %c0_4, %c0_5] : memref<4x75x392xf32, #tpu.memory_space<vmem>>, vector<1x75x392xf32>
    %5 = vector.shape_cast %4 : vector<1x75x392xf32> to vector<75x392xf32>
    %cst_6 = arith.constant dense<0.000000e+00> : vector<6x392xf32>
    %6 = tpu.matmul %0, %5, %cst_6 {dimension_numbers = #tpu.dot_dimension_numbers<[1], [0], [0], [1], [0, 0, 1, 1], [], []>} : vector<6x75xf32>, vector<75x392xf32>, vector<6x392xf32> -> vector<6x392xf32>
    %7 = arith.maximumf %3, %6 : vector<6x392xf32>
    %c2 = arith.constant 2 : index
    %c0_7 = arith.constant 0 : index
    %c0_8 = arith.constant 0 : index
    %8 = vector.load %arg1[%c2, %c0_7, %c0_8] : memref<4x75x392xf32, #tpu.memory_space<vmem>>, vector<1x75x392xf32>
    %9 = vector.shape_cast %8 : vector<1x75x392xf32> to vector<75x392xf32>
    %cst_9 = arith.constant dense<0.000000e+00> : vector<6x392xf32>
    %10 = tpu.matmul %0, %9, %cst_9 {dimension_numbers = #tpu.dot_dimension_numbers<[1], [0], [0], [1], [0, 0, 1, 1], [], []>} : vector<6x75xf32>, vector<75x392xf32>, vector<6x392xf32> -> vector<6x392xf32>
    %11 = arith.maximumf %7, %10 : vector<6x392xf32>
    %c3 = arith.constant 3 : index
    %c0_10 = arith.constant 0 : index
    %c0_11 = arith.constant 0 : index
    %12 = vector.load %arg1[%c3, %c0_10, %c0_11] : memref<4x75x392xf32, #tpu.memory_space<vmem>>, vector<1x75x392xf32>
    %13 = vector.shape_cast %12 : vector<1x75x392xf32> to vector<75x392xf32>
    %cst_12 = arith.constant dense<0.000000e+00> : vector<6x392xf32>
    %14 = tpu.matmul %0, %13, %cst_12 {dimension_numbers = #tpu.dot_dimension_numbers<[1], [0], [0], [1], [0, 0, 1, 1], [], []>} : vector<6x75xf32>, vector<75x392xf32>, vector<6x392xf32> -> vector<6x392xf32>
    %15 = arith.maximumf %11, %14 : vector<6x392xf32>
    %c0_13 = arith.constant 0 : index
    %c0_14 = arith.constant 0 : index
    %16 = vector.load %arg3[%c0_13, %c0_14] : memref<6x1xf32, #tpu.memory_space<vmem>>, vector<6x1xf32>
    %17 = vector.broadcast %16 : vector<6x1xf32> to vector<6x392xf32>
    %18 = arith.addf %15, %17 : vector<6x392xf32>
    %cst_15 = arith.constant 0.000000e+00 : f32
    %19 = vector.broadcast %cst_15 : f32 to vector<6x392xf32>
    %20 = arith.maximumf %18, %19 : vector<6x392xf32>
    %c0_16 = arith.constant 0 : index
    %c0_17 = arith.constant 0 : index
    %21 = vector.load %arg4[%c0_16, %c0_17] : memref<6x392xf32, #tpu.memory_space<vmem>>, vector<6x392xf32>
    tpu.vector_store %arg4[%c0_16, %c0_17], %20 {strides = array<i32>} : memref<6x392xf32, #tpu.memory_space<vmem>>, vector<6x392xf32>,
    return
  }
  func.func @transform_0(%arg0: i32) -> (i32, i32, i32) {
    %c0_i32 = arith.constant 0 : i32
    %c0_i32_0 = arith.constant 0 : i32
    %c0_i32_1 = arith.constant 0 : i32
    %c0_i32_2 = arith.constant 0 : i32
    return %c0_i32, %c0_i32_0, %c0_i32_1 : i32, i32, i32
  }
  func.func @transform_1(%arg0: i32) -> (i32, i32) {
    %c0_i32 = arith.constant 0 : i32
    %c0_i32_0 = arith.constant 0 : i32
    %c0_i32_1 = arith.constant 0 : i32
    return %c0_i32, %c0_i32_0 : i32, i32
  }
  func.func @transform_2(%arg0: i32) -> (i32, i32) {
    %c0_i32 = arith.constant 0 : i32
    %c0_i32_0 = arith.constant 0 : i32
    %c0_i32_1 = arith.constant 0 : i32
    return %c0_i32, %c0_i32_0 : i32, i32
  }
  func.func @transform_3(%arg0: i32) -> (i32, i32) {
    %c0_i32 = arith.constant 0 : i32
    %c0_i32_0 = arith.constant 0 : i32
    %c0_i32_1 = arith.constant 0 : i32
    return %c0_i32, %c0_i32_0 : i32, i32
  }
}

module attributes {stable_mosaic.version = 11 : i64} {
  func.func @_conv_relu_pool_kernel(%arg0: i32, %arg1: memref<4x150x50xf32, #tpu.memory_space<vmem>>, %arg2: memref<16x150xf32, #tpu.memory_space<vmem>>, %arg3: memref<16x1xf32, #tpu.memory_space<vmem>>, %arg4: memref<16x50xf32, #tpu.memory_space<vmem>>) attributes {dimension_semantics = [#tpu.dimension_semantics<arbitrary>], iteration_bounds = array<i64: 1>, scalar_prefetch = 0 : i64, scratch_operands = 0 : i64, tpu.core_type = #tpu.core_type<tc>, window_params = [{pipeline_mode = #tpu.pipeline_mode<synchronous>, transform_indices = @transform_0, window_bounds = array<i64: 4, 150, 50>}, {pipeline_mode = #tpu.pipeline_mode<synchronous>, transform_indices = @transform_1, window_bounds = array<i64: 16, 150>}, {pipeline_mode = #tpu.pipeline_mode<synchronous>, transform_indices = @transform_2, window_bounds = array<i64: 16, 1>}, {pipeline_mode = #tpu.pipeline_mode<synchronous>, transform_indices = @transform_3, window_bounds = array<i64: 16, 50>}]} {
    %c0 = arith.constant 0 : index
    %c0_0 = arith.constant 0 : index
    %0 = vector.load %arg2[%c0, %c0_0] : memref<16x150xf32, #tpu.memory_space<vmem>>, vector<16x150xf32>
    %c0_1 = arith.constant 0 : index
    %c0_2 = arith.constant 0 : index
    %c0_3 = arith.constant 0 : index
    %1 = vector.load %arg1[%c0_1, %c0_2, %c0_3] : memref<4x150x50xf32, #tpu.memory_space<vmem>>, vector<1x150x50xf32>
    %2 = vector.shape_cast %1 : vector<1x150x50xf32> to vector<150x50xf32>
    %cst = arith.constant dense<0.000000e+00> : vector<16x50xf32>
    %3 = tpu.matmul %0, %2, %cst {dimension_numbers = #tpu.dot_dimension_numbers<[1], [0], [0], [1], [0, 0, 1, 1], [], []>} : vector<16x150xf32>, vector<150x50xf32>, vector<16x50xf32> -> vector<16x50xf32>
    %c1 = arith.constant 1 : index
    %c0_4 = arith.constant 0 : index
    %c0_5 = arith.constant 0 : index
    %4 = vector.load %arg1[%c1, %c0_4, %c0_5] : memref<4x150x50xf32, #tpu.memory_space<vmem>>, vector<1x150x50xf32>
    %5 = vector.shape_cast %4 : vector<1x150x50xf32> to vector<150x50xf32>
    %cst_6 = arith.constant dense<0.000000e+00> : vector<16x50xf32>
    %6 = tpu.matmul %0, %5, %cst_6 {dimension_numbers = #tpu.dot_dimension_numbers<[1], [0], [0], [1], [0, 0, 1, 1], [], []>} : vector<16x150xf32>, vector<150x50xf32>, vector<16x50xf32> -> vector<16x50xf32>
    %7 = arith.maximumf %3, %6 : vector<16x50xf32>
    %c2 = arith.constant 2 : index
    %c0_7 = arith.constant 0 : index
    %c0_8 = arith.constant 0 : index
    %8 = vector.load %arg1[%c2, %c0_7, %c0_8] : memref<4x150x50xf32, #tpu.memory_space<vmem>>, vector<1x150x50xf32>
    %9 = vector.shape_cast %8 : vector<1x150x50xf32> to vector<150x50xf32>
    %cst_9 = arith.constant dense<0.000000e+00> : vector<16x50xf32>
    %10 = tpu.matmul %0, %9, %cst_9 {dimension_numbers = #tpu.dot_dimension_numbers<[1], [0], [0], [1], [0, 0, 1, 1], [], []>} : vector<16x150xf32>, vector<150x50xf32>, vector<16x50xf32> -> vector<16x50xf32>
    %11 = arith.maximumf %7, %10 : vector<16x50xf32>
    %c3 = arith.constant 3 : index
    %c0_10 = arith.constant 0 : index
    %c0_11 = arith.constant 0 : index
    %12 = vector.load %arg1[%c3, %c0_10, %c0_11] : memref<4x150x50xf32, #tpu.memory_space<vmem>>, vector<1x150x50xf32>
    %13 = vector.shape_cast %12 : vector<1x150x50xf32> to vector<150x50xf32>
    %cst_12 = arith.constant dense<0.000000e+00> : vector<16x50xf32>
    %14 = tpu.matmul %0, %13, %cst_12 {dimension_numbers = #tpu.dot_dimension_numbers<[1], [0], [0], [1], [0, 0, 1, 1], [], []>} : vector<16x150xf32>, vector<150x50xf32>, vector<16x50xf32> -> vector<16x50xf32>
    %15 = arith.maximumf %11, %14 : vector<16x50xf32>
    %c0_13 = arith.constant 0 : index
    %c0_14 = arith.constant 0 : index
    %16 = vector.load %arg3[%c0_13, %c0_14] : memref<16x1xf32, #tpu.memory_space<vmem>>, vector<16x1xf32>
    %17 = vector.broadcast %16 : vector<16x1xf32> to vector<16x50xf32>
    %18 = arith.addf %15, %17 : vector<16x50xf32>
    %cst_15 = arith.constant 0.000000e+00 : f32
    %19 = vector.broadcast %cst_15 : f32 to vector<16x50xf32>
    %20 = arith.maximumf %18, %19 : vector<16x50xf32>
    %c0_16 = arith.constant 0 : index
    %c0_17 = arith.constant 0 : index
    %21 = vector.load %arg4[%c0_16, %c0_17] : memref<16x50xf32, #tpu.memory_space<vmem>>, vector<16x50xf32>
    tpu.vector_store %arg4[%c0_16, %c0_17], %20 {strides = array<i32>} : memref<16x50xf32, #tpu.memory_space<vmem>>, vector<16x50xf32>,
    return
  }
  func.func @transform_0(%arg0: i32) -> (i32, i32, i32) {
    %c0_i32 = arith.constant 0 : i32
    %c0_i32_0 = arith.constant 0 : i32
    %c0_i32_1 = arith.constant 0 : i32
    %c0_i32_2 = arith.constant 0 : i32
    return %c0_i32, %c0_i32_0, %c0_i32_1 : i32, i32, i32
  }
  func.func @transform_1(%arg0: i32) -> (i32, i32) {
    %c0_i32 = arith.constant 0 : i32
    %c0_i32_0 = arith.constant 0 : i32
    %c0_i32_1 = arith.constant 0 : i32
    return %c0_i32, %c0_i32_0 : i32, i32
  }
  func.func @transform_2(%arg0: i32) -> (i32, i32) {
    %c0_i32 = arith.constant 0 : i32
    %c0_i32_0 = arith.constant 0 : i32
    %c0_i32_1 = arith.constant 0 : i32
    return %c0_i32, %c0_i32_0 : i32, i32
  }
  func.func @transform_3(%arg0: i32) -> (i32, i32) {
    %c0_i32 = arith.constant 0 : i32
    %c0_i32_0 = arith.constant 0 : i32
    %c0_i32_1 = arith.constant 0 : i32
    return %c0_i32, %c0_i32_0 : i32, i32
  }
}

module attributes {stable_mosaic.version = 11 : i64} {
  func.func @_mlp_kernel(%arg0: i32, %arg1: memref<2x400xf32, #tpu.memory_space<vmem>>, %arg2: memref<400x120xf32, #tpu.memory_space<vmem>>, %arg3: memref<1x120xf32, #tpu.memory_space<vmem>>, %arg4: memref<120x84xf32, #tpu.memory_space<vmem>>, %arg5: memref<1x84xf32, #tpu.memory_space<vmem>>, %arg6: memref<84x10xf32, #tpu.memory_space<vmem>>, %arg7: memref<1x10xf32, #tpu.memory_space<vmem>>, %arg8: memref<2x10xf32, #tpu.memory_space<vmem>>) attributes {dimension_semantics = [#tpu.dimension_semantics<arbitrary>], iteration_bounds = array<i64: 1>, scalar_prefetch = 0 : i64, scratch_operands = 0 : i64, tpu.core_type = #tpu.core_type<tc>, window_params = [{pipeline_mode = #tpu.pipeline_mode<synchronous>, transform_indices = @transform_0, window_bounds = array<i64: 2, 400>}, {pipeline_mode = #tpu.pipeline_mode<synchronous>, transform_indices = @transform_1, window_bounds = array<i64: 400, 120>}, {pipeline_mode = #tpu.pipeline_mode<synchronous>, transform_indices = @transform_2, window_bounds = array<i64: 1, 120>}, {pipeline_mode = #tpu.pipeline_mode<synchronous>, transform_indices = @transform_3, window_bounds = array<i64: 120, 84>}, {pipeline_mode = #tpu.pipeline_mode<synchronous>, transform_indices = @transform_4, window_bounds = array<i64: 1, 84>}, {pipeline_mode = #tpu.pipeline_mode<synchronous>, transform_indices = @transform_5, window_bounds = array<i64: 84, 10>}, {pipeline_mode = #tpu.pipeline_mode<synchronous>, transform_indices = @transform_6, window_bounds = array<i64: 1, 10>}, {pipeline_mode = #tpu.pipeline_mode<synchronous>, transform_indices = @transform_7, window_bounds = array<i64: 2, 10>}]} {
    %c0 = arith.constant 0 : index
    %c0_0 = arith.constant 0 : index
    %0 = vector.load %arg1[%c0, %c0_0] : memref<2x400xf32, #tpu.memory_space<vmem>>, vector<2x400xf32>
    %c0_1 = arith.constant 0 : index
    %c0_2 = arith.constant 0 : index
    %1 = vector.load %arg2[%c0_1, %c0_2] : memref<400x120xf32, #tpu.memory_space<vmem>>, vector<400x120xf32>
    %cst = arith.constant dense<0.000000e+00> : vector<2x120xf32>
    %2 = tpu.matmul %0, %1, %cst {dimension_numbers = #tpu.dot_dimension_numbers<[1], [0], [0], [1], [0, 0, 1, 1], [], []>} : vector<2x400xf32>, vector<400x120xf32>, vector<2x120xf32> -> vector<2x120xf32>
    %c0_3 = arith.constant 0 : index
    %c0_4 = arith.constant 0 : index
    %3 = vector.load %arg3[%c0_3, %c0_4] : memref<1x120xf32, #tpu.memory_space<vmem>>, vector<1x120xf32>
    %4 = vector.broadcast %3 : vector<1x120xf32> to vector<2x120xf32>
    %5 = arith.addf %2, %4 : vector<2x120xf32>
    %cst_5 = arith.constant 0.000000e+00 : f32
    %6 = vector.broadcast %cst_5 : f32 to vector<2x120xf32>
    %7 = arith.maximumf %5, %6 : vector<2x120xf32>
    %c0_6 = arith.constant 0 : index
    %c0_7 = arith.constant 0 : index
    %8 = vector.load %arg4[%c0_6, %c0_7] : memref<120x84xf32, #tpu.memory_space<vmem>>, vector<120x84xf32>
    %cst_8 = arith.constant dense<0.000000e+00> : vector<2x84xf32>
    %9 = tpu.matmul %7, %8, %cst_8 {dimension_numbers = #tpu.dot_dimension_numbers<[1], [0], [0], [1], [0, 0, 1, 1], [], []>} : vector<2x120xf32>, vector<120x84xf32>, vector<2x84xf32> -> vector<2x84xf32>
    %c0_9 = arith.constant 0 : index
    %c0_10 = arith.constant 0 : index
    %10 = vector.load %arg5[%c0_9, %c0_10] : memref<1x84xf32, #tpu.memory_space<vmem>>, vector<1x84xf32>
    %11 = vector.broadcast %10 : vector<1x84xf32> to vector<2x84xf32>
    %12 = arith.addf %9, %11 : vector<2x84xf32>
    %cst_11 = arith.constant 0.000000e+00 : f32
    %13 = vector.broadcast %cst_11 : f32 to vector<2x84xf32>
    %14 = arith.maximumf %12, %13 : vector<2x84xf32>
    %c0_12 = arith.constant 0 : index
    %c0_13 = arith.constant 0 : index
    %15 = vector.load %arg6[%c0_12, %c0_13] : memref<84x10xf32, #tpu.memory_space<vmem>>, vector<84x10xf32>
    %cst_14 = arith.constant dense<0.000000e+00> : vector<2x10xf32>
    %16 = tpu.matmul %14, %15, %cst_14 {dimension_numbers = #tpu.dot_dimension_numbers<[1], [0], [0], [1], [0, 0, 1, 1], [], []>} : vector<2x84xf32>, vector<84x10xf32>, vector<2x10xf32> -> vector<2x10xf32>
    %c0_15 = arith.constant 0 : index
    %c0_16 = arith.constant 0 : index
    %17 = vector.load %arg7[%c0_15, %c0_16] : memref<1x10xf32, #tpu.memory_space<vmem>>, vector<1x10xf32>
    %18 = vector.broadcast %17 : vector<1x10xf32> to vector<2x10xf32>
    %19 = arith.addf %16, %18 : vector<2x10xf32>
    %c0_17 = arith.constant 0 : index
    %c0_18 = arith.constant 0 : index
    %20 = vector.load %arg8[%c0_17, %c0_18] : memref<2x10xf32, #tpu.memory_space<vmem>>, vector<2x10xf32>
    tpu.vector_store %arg8[%c0_17, %c0_18], %19 {strides = array<i32>} : memref<2x10xf32, #tpu.memory_space<vmem>>, vector<2x10xf32>,
    return
  }
  func.func @transform_0(%arg0: i32) -> (i32, i32) {
    %c0_i32 = arith.constant 0 : i32
    %c0_i32_0 = arith.constant 0 : i32
    %c0_i32_1 = arith.constant 0 : i32
    return %c0_i32, %c0_i32_0 : i32, i32
  }
  func.func @transform_1(%arg0: i32) -> (i32, i32) {
    %c0_i32 = arith.constant 0 : i32
    %c0_i32_0 = arith.constant 0 : i32
    %c0_i32_1 = arith.constant 0 : i32
    return %c0_i32, %c0_i32_0 : i32, i32
  }
  func.func @transform_2(%arg0: i32) -> (i32, i32) {
    %c0_i32 = arith.constant 0 : i32
    %c0_i32_0 = arith.constant 0 : i32
    %c0_i32_1 = arith.constant 0 : i32
    return %c0_i32, %c0_i32_0 : i32, i32
  }
  func.func @transform_3(%arg0: i32) -> (i32, i32) {
    %c0_i32 = arith.constant 0 : i32
    %c0_i32_0 = arith.constant 0 : i32
    %c0_i32_1 = arith.constant 0 : i32
    return %c0_i32, %c0_i32_0 : i32, i32
  }
  func.func @transform_4(%arg0: i32) -> (i32, i32) {
    %c0_i32 = arith.constant 0 : i32
    %c0_i32_0 = arith.constant 0 : i32
    %c0_i32_1 = arith.constant 0 : i32
    return %c0_i32, %c0_i32_0 : i32, i32
  }
  func.func @transform_5(%arg0: i32) -> (i32, i32) {
    %c0_i32 = arith.constant 0 : i32
    %c0_i32_0 = arith.constant 0 : i32
    %c0_i32_1 = arith.constant 0 : i32
    return %c0_i32, %c0_i32_0 : i32, i32
  }
  func.func @transform_6(%arg0: i32) -> (i32, i32) {
    %c0_i32 = arith.constant 0 : i32
    %c0_i32_0 = arith.constant 0 : i32
    %c0_i32_1 = arith.constant 0 : i32
    return %c0_i32, %c0_i32_0 : i32, i32
  }
  func.func @transform_7(%arg0: i32) -> (i32, i32) {
    %c0_i32 = arith.constant 0 : i32
    %c0_i32_0 = arith.constant 0 : i32
    %c0_i32_1 = arith.constant 0 : i32
    return %c0_i32, %c0_i32_0 : i32, i32
  }
}

</mosaic_0001>

<bundles_post_ra>
// kernel: net_forward.3
= control target key start
LH: loop header
LB: loop body
LE: loop exit
PB: predicated region body
PF: predicated region fallthrough
CT: control target
= control target key end

     0   :  { %vm59_vm0 = vcmask 1042432   ;;  %vm55_vm1 = vcmask 613376   ;;  %vm580_vm2 = vcmask 62464   ;;  %s1309_s0 = inlined_call_operand.vmem [shape: f32[4,75,392], index: 0, kind: input, shape index: {}]   ;;  %s1310_s1 = inlined_call_operand.vmem [shape: f32[6,75], index: 1, kind: input, shape index: {}]   ;;  %s1311_s2 = inlined_call_operand.vmem [shape: f32[6,1], index: 2, kind: input, shape index: {}]   ;;  %s1312_s3 = inlined_call_operand.vmem [shape: f32[6,392], index: 3, kind: output, shape index: {}]  }
   0x1   :  { %v51_v0 = vld [vmem:[%s1309_s0 + $0x120] sm:$0x7]  ;;  %v52_v1 = vld [vmem:[%s1309_s0 + $0x128] sm:$0x7]  ;;  %v53_v2 = vld [vmem:[%s1309_s0 + $0x130] sm:$0x7] }
   0x2   :  { %586 = vmatpush.msk.msra.mxu0 %vm59_vm0, %v51_v0  ;;  %588 = vmatpush.msk.msra.mxu1 %vm59_vm0, %v52_v1  ;;  %v54_v3 = vld [vmem:[%s1309_s0 + $0x138] sm:$0x7]  ;;  %v47_v4 = vld [vmem:[%s1309_s0 + $0x100] sm:$0xff]  ;;  %v48_v5 = vld [vmem:[%s1309_s0 + $0x108] sm:$0xff] }
   0x3   :  { %590 = vmatpush.msk.msra.mxu2 %vm59_vm0, %v53_v2  ;;  %592 = vmatpush.msk.msra.mxu3 %vm59_vm0, %v54_v3  ;;  %v49_v6 = vld [vmem:[%s1309_s0 + $0x110] sm:$0xff]  ;;  %v50_v7 = vld [vmem:[%s1309_s0 + $0x118] sm:$0xff]  ;;  %v43_v8 = vld [vmem:[%s1309_s0 + $0xe0] sm:$0xff] }
   0x4   :  { %79 = vmatpush.msra.mxu0 %v47_v4  ;;  %99 = vmatpush.msra.mxu1 %v48_v5  ;;  %v44_v9 = vld [vmem:[%s1309_s0 + $0xe8] sm:$0xff]  ;;  %v45_v10 = vld [vmem:[%s1309_s0 + $0xf0] sm:$0xff]  ;;  %v46_v11 = vld [vmem:[%s1309_s0 + $0xf8] sm:$0xff] }
   0x5   :  { %119 = vmatpush.msra.mxu2 %v49_v6  ;;  %139 = vmatpush.msra.mxu3 %v50_v7  ;;  %v39_v12 = vld [vmem:[%s1309_s0 + $0xc0] sm:$0xff]  ;;  %v40_v13 = vld [vmem:[%s1309_s0 + $0xc8] sm:$0xff]  ;;  %v41_v14 = vld [vmem:[%s1309_s0 + $0xd0] sm:$0xff] }
   0x6   :  { %80 = vmatpush.msra.mxu0 %v43_v8  ;;  %100 = vmatpush.msra.mxu1 %v44_v9  ;;  %v42_v15 = vld [vmem:[%s1309_s0 + $0xd8] sm:$0xff]  ;;  %v35_v16 = vld [vmem:[%s1309_s0 + $0xa0] sm:$0xff]  ;;  %v36_v17 = vld [vmem:[%s1309_s0 + $0xa8] sm:$0xff] }
   0x7   :  { %120 = vmatpush.msra.mxu2 %v45_v10  ;;  %140 = vmatpush.msra.mxu3 %v46_v11  ;;  %v37_v18 = vld [vmem:[%s1309_s0 + $0xb0] sm:$0xff]  ;;  %v38_v19 = vld [vmem:[%s1309_s0 + $0xb8] sm:$0xff]  ;;  %v31_v20 = vld [vmem:[%s1309_s0 + $0x80] sm:$0xff] }
   0x8   :  { %81 = vmatpush.msra.mxu0 %v39_v12  ;;  %101 = vmatpush.msra.mxu1 %v40_v13  ;;  %v32_v21 = vld [vmem:[%s1309_s0 + $0x88] sm:$0xff]  ;;  %v33_v22 = vld [vmem:[%s1309_s0 + $0x90] sm:$0xff]  ;;  %v34_v23 = vld [vmem:[%s1309_s0 + $0x98] sm:$0xff] }
   0x9   :  { %121 = vmatpush.msra.mxu2 %v41_v14  ;;  %141 = vmatpush.msra.mxu3 %v42_v15  ;;  %v27_v24 = vld [vmem:[%s1309_s0 + $0x60] sm:$0xff]  ;;  %v28_v25 = vld [vmem:[%s1309_s0 + $0x68] sm:$0xff]  ;;  %v29_v26 = vld [vmem:[%s1309_s0 + $0x70] sm:$0xff] }
   0xa   :  { %82 = vmatpush.msra.mxu0 %v35_v16  ;;  %102 = vmatpush.msra.mxu1 %v36_v17  ;;  %v30_v27 = vld [vmem:[%s1309_s0 + $0x78] sm:$0xff]  ;;  %v23_v28 = vld [vmem:[%s1309_s0 + $0x40] sm:$0xff]  ;;  %v24_v29 = vld [vmem:[%s1309_s0 + $0x48] sm:$0xff] }
   0xb   :  { %122 = vmatpush.msra.mxu2 %v37_v18  ;;  %142 = vmatpush.msra.mxu3 %v38_v19  ;;  %v25_v30 = vld [vmem:[%s1309_s0 + $0x50] sm:$0xff]  ;;  %v26_v31 = vld [vmem:[%s1309_s0 + $0x58] sm:$0xff]  ;;  %v19_v32 = vld [vmem:[%s1309_s0 + $0x20] sm:$0xff] }
   0xc   :  { %83 = vmatpush.msra.mxu0 %v31_v20  ;;  %103 = vmatpush.msra.mxu1 %v32_v21  ;;  %v20_v33 = vld [vmem:[%s1309_s0 + $0x28] sm:$0xff]  ;;  %v21_v34 = vld [vmem:[%s1309_s0 + $0x30] sm:$0xff]  ;;  %v22_v35 = vld [vmem:[%s1309_s0 + $0x38] sm:$0xff] }
   0xd   :  { %123 = vmatpush.msra.mxu2 %v33_v22  ;;  %143 = vmatpush.msra.mxu3 %v34_v23  ;;  %v15_v36 = vld [vmem:[%s1309_s0] sm:$0xff]  ;;  %v16_v37 = vld [vmem:[%s1309_s0 + $0x8] sm:$0xff]  ;;  %v17_v38 = vld [vmem:[%s1309_s0 + $0x10] sm:$0xff] }
   0xe   :  { %84 = vmatpush.msra.mxu0 %v27_v24  ;;  %104 = vmatpush.msra.mxu1 %v28_v25  ;;  %v18_v39 = vld [vmem:[%s1309_s0 + $0x18] sm:$0xff]  ;;  %v630_v40 = vld [vmem:[%s1309_s0 + $0x260] sm:$0x7]  ;;  %v631_v41 = vld [vmem:[%s1309_s0 + $0x268] sm:$0x7] }
   0xf   :  { %124 = vmatpush.msra.mxu2 %v29_v26  ;;  %144 = vmatpush.msra.mxu3 %v30_v27  ;;  %v632_v42 = vld [vmem:[%s1309_s0 + $0x270] sm:$0x7]  ;;  %v633_v43 = vld [vmem:[%s1309_s0 + $0x278] sm:$0x7]  ;;  %v626_v44 = vld [vmem:[%s1309_s0 + $0x240] sm:$0xff] }
  0x10   :  { %85 = vmatpush.msra.mxu0 %v23_v28  ;;  %105 = vmatpush.msra.mxu1 %v24_v29  ;;  %v627_v45 = vld [vmem:[%s1309_s0 + $0x248] sm:$0xff]  ;;  %v628_v46 = vld [vmem:[%s1309_s0 + $0x250] sm:$0xff]  ;;  %v629_v47 = vld [vmem:[%s1309_s0 + $0x258] sm:$0xff] }
  0x11   :  { %125 = vmatpush.msra.mxu2 %v25_v30  ;;  %145 = vmatpush.msra.mxu3 %v26_v31  ;;  %v622_v48 = vld [vmem:[%s1309_s0 + $0x220] sm:$0xff]  ;;  %v623_v49 = vld [vmem:[%s1309_s0 + $0x228] sm:$0xff]  ;;  %v624_v50 = vld [vmem:[%s1309_s0 + $0x230] sm:$0xff] }
  0x12   :  { %86 = vmatpush.msra.mxu0 %v19_v32  ;;  %106 = vmatpush.msra.mxu1 %v20_v33  ;;  %v625_v51 = vld [vmem:[%s1309_s0 + $0x238] sm:$0xff]  ;;  %v618_v52 = vld [vmem:[%s1309_s0 + $0x200] sm:$0xff]  ;;  %v619_v53 = vld [vmem:[%s1309_s0 + $0x208] sm:$0xff] }
  0x13   :  { %126 = vmatpush.msra.mxu2 %v21_v34  ;;  %146 = vmatpush.msra.mxu3 %v22_v35  ;;  %v620_v54 = vld [vmem:[%s1309_s0 + $0x210] sm:$0xff]  ;;  %v621_v55 = vld [vmem:[%s1309_s0 + $0x218] sm:$0xff]  ;;  %v614_v56 = vld [vmem:[%s1309_s0 + $0x1e0] sm:$0xff] }
  0x14   :  { %87 = vmatpush.msra.mxu0 %v15_v36  ;;  %107 = vmatpush.msra.mxu1 %v16_v37  ;;  %v615_v57 = vld [vmem:[%s1309_s0 + $0x1e8] sm:$0xff]  ;;  %v616_v58 = vld [vmem:[%s1309_s0 + $0x1f0] sm:$0xff]  ;;  %v617_v59 = vld [vmem:[%s1309_s0 + $0x1f8] sm:$0xff] }
  0x15   :  { %127 = vmatpush.msra.mxu2 %v17_v38  ;;  %147 = vmatpush.msra.mxu3 %v18_v39  ;;  %v610_v60 = vld [vmem:[%s1309_s0 + $0x1c0] sm:$0xff]  ;;  %v611_v61 = vld [vmem:[%s1309_s0 + $0x1c8] sm:$0xff]  ;;  %v612_v62 = vld [vmem:[%s1309_s0 + $0x1d0] sm:$0xff] }
  0x16   :  { %634 = vmatpush.msk.msrb.mxu0 %vm59_vm0, %v630_v40  ;;  %636 = vmatpush.msk.msrb.mxu1 %vm59_vm0, %v631_v41  ;;  %v613_v63 = vld [vmem:[%s1309_s0 + $0x1d8] sm:$0xff]  ;;  %v964_v0 = vld [vmem:[%s1310_s1] sm:$0x3f]  ;;  %v607_v2 = vld [vmem:[%s1309_s0 + $0x1a8] sm:$0xff] }
  0x17   :  { %638 = vmatpush.msk.msrb.mxu2 %vm59_vm0, %v632_v42  ;;  %640 = vmatpush.msk.msrb.mxu3 %vm59_vm0, %v633_v43  ;;  %v606_v1 = vld [vmem:[%s1309_s0 + $0x1a0] sm:$0xff]  ;;  %v608_v3 = vld [vmem:[%s1309_s0 + $0x1b0] sm:$0xff]  ;;  %v609_v4 = vld [vmem:[%s1309_s0 + $0x1b8] sm:$0xff] }
  0x18   :  { %212 = vmatpush.msrb.mxu0 %v626_v44  ;;  %232 = vmatpush.msrb.mxu1 %v627_v45  ;;  %v602_v5 = vld [vmem:[%s1309_s0 + $0x180] sm:$0xff]  ;;  %v603_v6 = vld [vmem:[%s1309_s0 + $0x188] sm:$0xff]  ;;  %v604_v7 = vld [vmem:[%s1309_s0 + $0x190] sm:$0xff] }
  0x19   :  { %252 = vmatpush.msrb.mxu2 %v628_v46  ;;  %272 = vmatpush.msrb.mxu3 %v629_v47  ;;  %v605_v8 = vld [vmem:[%s1309_s0 + $0x198] sm:$0xff]  ;;  %v598_v9 = vld [vmem:[%s1309_s0 + $0x160] sm:$0xff]  ;;  %v599_v10 = vld [vmem:[%s1309_s0 + $0x168] sm:$0xff] }
  0x1a   :  { %213 = vmatpush.msrb.mxu0 %v622_v48  ;;  %233 = vmatpush.msrb.mxu1 %v623_v49  ;;  %v600_v11 = vld [vmem:[%s1309_s0 + $0x170] sm:$0xff]  ;;  %v601_v12 = vld [vmem:[%s1309_s0 + $0x178] sm:$0xff]  ;;  %v594_v13 = vld [vmem:[%s1309_s0 + $0x140] sm:$0xff] }
  0x1b   :  { %253 = vmatpush.msrb.mxu2 %v624_v50  ;;  %273 = vmatpush.msrb.mxu3 %v625_v51  ;;  %v595_v14 = vld [vmem:[%s1309_s0 + $0x148] sm:$0xff]  ;;  %v596_v15 = vld [vmem:[%s1309_s0 + $0x150] sm:$0xff]  ;;  %v597_v16 = vld [vmem:[%s1309_s0 + $0x158] sm:$0xff] }
  0x1c   :  { %214 = vmatpush.msrb.mxu0 %v618_v52  ;;  %234 = vmatpush.msrb.mxu1 %v619_v53  ;;  %v678_v17 = vld [vmem:[%s1309_s0 + $0x3a0] sm:$0x7]  ;;  %v679_v18 = vld [vmem:[%s1309_s0 + $0x3a8] sm:$0x7]  ;;  %v680_v19 = vld [vmem:[%s1309_s0 + $0x3b0] sm:$0x7] }
  0x1d   :  { %254 = vmatpush.msrb.mxu2 %v620_v54  ;;  %274 = vmatpush.msrb.mxu3 %v621_v55  ;;  %v681_v20 = vld [vmem:[%s1309_s0 + $0x3b8] sm:$0x7]  ;;  %v674_v21 = vld [vmem:[%s1309_s0 + $0x380] sm:$0xff]  ;;  %v675_v22 = vld [vmem:[%s1309_s0 + $0x388] sm:$0xff] }
  0x1e   :  { %215 = vmatpush.msrb.mxu0 %v614_v56  ;;  %235 = vmatpush.msrb.mxu1 %v615_v57  ;;  %v676_v23 = vld [vmem:[%s1309_s0 + $0x390] sm:$0xff]  ;;  %v677_v24 = vld [vmem:[%s1309_s0 + $0x398] sm:$0xff]  ;;  %v670_v25 = vld [vmem:[%s1309_s0 + $0x360] sm:$0xff] }
  0x1f   :  { %255 = vmatpush.msrb.mxu2 %v616_v58  ;;  %275 = vmatpush.msrb.mxu3 %v617_v59  ;;  %v671_v26 = vld [vmem:[%s1309_s0 + $0x368] sm:$0xff]  ;;  %v672_v27 = vld [vmem:[%s1309_s0 + $0x370] sm:$0xff]  ;;  %v673_v28 = vld [vmem:[%s1309_s0 + $0x378] sm:$0xff] }
  0x20   :  { %216 = vmatpush.msrb.mxu0 %v610_v60  ;;  %236 = vmatpush.msrb.mxu1 %v611_v61  ;;  %v666_v29 = vld [vmem:[%s1309_s0 + $0x340] sm:$0xff]  ;;  %v667_v30 = vld [vmem:[%s1309_s0 + $0x348] sm:$0xff]  ;;  %v668_v31 = vld [vmem:[%s1309_s0 + $0x350] sm:$0xff] }
  0x21   :  { %256 = vmatpush.msrb.mxu2 %v612_v62  ;;  %276 = vmatpush.msrb.mxu3 %v613_v63  ;;  %v669_v32 = vld [vmem:[%s1309_s0 + $0x358] sm:$0xff]  ;;  %v662_v33 = vld [vmem:[%s1309_s0 + $0x320] sm:$0xff]  ;;  %v663_v34 = vld [vmem:[%s1309_s0 + $0x328] sm:$0xff] }
  0x22   :  { %591 = vmatmul.msk.f32.vlgmr.msra.gmra.mxu2 %vm55_vm1, %v964_v0  ;;  %593 = vmatmul.msk.f32.vlgmr.msra.gmra.mxu3 %vm55_vm1, %v964_v0  ;;  %v664_v35 = vld [vmem:[%s1309_s0 + $0x330] sm:$0xff]  ;;  %v665_v36 = vld [vmem:[%s1309_s0 + $0x338] sm:$0xff]  ;;  %v658_v37 = vld [vmem:[%s1309_s0 + $0x300] sm:$0xff] }
  0x23   :  { %217 = vmatpush.msrb.mxu0 %v606_v1  ;;  %237 = vmatpush.msrb.mxu1 %v607_v2  ;;  %v659_v38 = vld [vmem:[%s1309_s0 + $0x308] sm:$0xff]  ;;  %v660_v39 = vld [vmem:[%s1309_s0 + $0x310] sm:$0xff]  ;;  %v661_v40 = vld [vmem:[%s1309_s0 + $0x318] sm:$0xff] }
  0x24   :  { %257 = vmatpush.msrb.mxu2 %v608_v3  ;;  %277 = vmatpush.msrb.mxu3 %v609_v4  ;;  %v654_v41 = vld [vmem:[%s1309_s0 + $0x2e0] sm:$0xff]  ;;  %v655_v42 = vld [vmem:[%s1309_s0 + $0x2e8] sm:$0xff]  ;;  %v656_v43 = vld [vmem:[%s1309_s0 + $0x2f0] sm:$0xff] }
  0x25   :  { %218 = vmatpush.msrb.mxu0 %v602_v5  ;;  %238 = vmatpush.msrb.mxu1 %v603_v6  ;;  %v657_v44 = vld [vmem:[%s1309_s0 + $0x2f8] sm:$0xff]  ;;  %v650_v45 = vld [vmem:[%s1309_s0 + $0x2c0] sm:$0xff]  ;;  %v651_v46 = vld [vmem:[%s1309_s0 + $0x2c8] sm:$0xff] }
  0x26   :  { %258 = vmatpush.msrb.mxu2 %v604_v7  ;;  %278 = vmatpush.msrb.mxu3 %v605_v8  ;;  %v652_v47 = vld [vmem:[%s1309_s0 + $0x2d0] sm:$0xff]  ;;  %v653_v48 = vld [vmem:[%s1309_s0 + $0x2d8] sm:$0xff]  ;;  %v646_v49 = vld [vmem:[%s1309_s0 + $0x2a0] sm:$0xff] }
  0x27   :  { %219 = vmatpush.msrb.mxu0 %v598_v9  ;;  %239 = vmatpush.msrb.mxu1 %v599_v10  ;;  %v647_v50 = vld [vmem:[%s1309_s0 + $0x2a8] sm:$0xff]  ;;  %v648_v51 = vld [vmem:[%s1309_s0 + $0x2b0] sm:$0xff]  ;;  %v649_v52 = vld [vmem:[%s1309_s0 + $0x2b8] sm:$0xff] }
  0x28   :  { %259 = vmatpush.msrb.mxu2 %v600_v11  ;;  %279 = vmatpush.msrb.mxu3 %v601_v12  ;;  %v642_v53 = vld [vmem:[%s1309_s0 + $0x280] sm:$0xff]  ;;  %v643_v54 = vld [vmem:[%s1309_s0 + $0x288] sm:$0xff]  ;;  %v644_v55 = vld [vmem:[%s1309_s0 + $0x290] sm:$0xff] }
  0x29   :  { %587 = vmatmul.msk.f32.vlgmr.msra.gmra.mxu0 %vm55_vm1, %v964_v0  ;;  %589 = vmatmul.msk.f32.vlgmr.msra.gmra.mxu1 %vm55_vm1, %v964_v0  ;;  %v645_v56 = vld [vmem:[%s1309_s0 + $0x298] sm:$0xff]  ;;  %v726_v57 = vld [vmem:[%s1309_s0 + $0x4e0] sm:$0x7]  ;;  %v727_v58 = vld [vmem:[%s1309_s0 + $0x4e8] sm:$0x7] }
  0x2a   :  { %220 = vmatpush.msrb.mxu0 %v594_v13  ;;  %240 = vmatpush.msrb.mxu1 %v595_v14  ;;  %v728_v59 = vld [vmem:[%s1309_s0 + $0x4f0] sm:$0x7]  ;;  %v729_v60 = vld [vmem:[%s1309_s0 + $0x4f8] sm:$0x7]  ;;  %v722_v61 = vld [vmem:[%s1309_s0 + $0x4c0] sm:$0xff] }
  0x2b   :  { %260 = vmatpush.msrb.mxu2 %v596_v15  ;;  %280 = vmatpush.msrb.mxu3 %v597_v16  ;;  %v723_v62 = vld [vmem:[%s1309_s0 + $0x4c8] sm:$0xff]  ;;  %v724_v63 = vld [vmem:[%s1309_s0 + $0x4d0] sm:$0xff]  ;;  %v725_v1 = vld [vmem:[%s1309_s0 + $0x4d8] sm:$0xff] }
  0x2c   :  { %639 = vmatmul.msk.f32.vlgmr.msrb.gmra.mxu2 %vm55_vm1, %v964_v0  ;;  %641 = vmatmul.msk.f32.vlgmr.msrb.gmra.mxu3 %vm55_vm1, %v964_v0  ;;  %v718_v2 = vld [vmem:[%s1309_s0 + $0x4a0] sm:$0xff]  ;;  %v719_v3 = vld [vmem:[%s1309_s0 + $0x4a8] sm:$0xff]  ;;  %v720_v4 = vld [vmem:[%s1309_s0 + $0x4b0] sm:$0xff] }
  0x2d   :  { %682 = vmatpush.msk.msra.mxu0 %vm59_vm0, %v678_v17  ;;  %684 = vmatpush.msk.msra.mxu1 %vm59_vm0, %v679_v18  ;;  %v721_v5 = vld [vmem:[%s1309_s0 + $0x4b8] sm:$0xff]  ;;  %v714_v6 = vld [vmem:[%s1309_s0 + $0x480] sm:$0xff]  ;;  %v715_v7 = vld [vmem:[%s1309_s0 + $0x488] sm:$0xff] }
  0x2e   :  { %686 = vmatpush.msk.msra.mxu2 %vm59_vm0, %v680_v19  ;;  %688 = vmatpush.msk.msra.mxu3 %vm59_vm0, %v681_v20  ;;  %v716_v8 = vld [vmem:[%s1309_s0 + $0x490] sm:$0xff]  ;;  %v717_v9 = vld [vmem:[%s1309_s0 + $0x498] sm:$0xff]  ;;  %v710_v10 = vld [vmem:[%s1309_s0 + $0x460] sm:$0xff] }
  0x2f   :  { %349 = vmatpush.msra.mxu0 %v674_v21  ;;  %369 = vmatpush.msra.mxu1 %v675_v22  ;;  %v711_v11 = vld [vmem:[%s1309_s0 + $0x468] sm:$0xff]  ;;  %v712_v12 = vld [vmem:[%s1309_s0 + $0x470] sm:$0xff]  ;;  %v713_v13 = vld [vmem:[%s1309_s0 + $0x478] sm:$0xff] }
  0x30   :  { %389 = vmatpush.msra.mxu2 %v676_v23  ;;  %409 = vmatpush.msra.mxu3 %v677_v24  ;;  %v706_v14 = vld [vmem:[%s1309_s0 + $0x440] sm:$0xff]  ;;  %v707_v15 = vld [vmem:[%s1309_s0 + $0x448] sm:$0xff]  ;;  %v708_v16 = vld [vmem:[%s1309_s0 + $0x450] sm:$0xff] }
  0x31   :  { %350 = vmatpush.msra.mxu0 %v670_v25  ;;  %370 = vmatpush.msra.mxu1 %v671_v26  ;;  %v709_v17 = vld [vmem:[%s1309_s0 + $0x458] sm:$0xff]  ;;  %v702_v18 = vld [vmem:[%s1309_s0 + $0x420] sm:$0xff]  ;;  %v703_v19 = vld [vmem:[%s1309_s0 + $0x428] sm:$0xff] }
  0x32   :  { %390 = vmatpush.msra.mxu2 %v672_v27  ;;  %410 = vmatpush.msra.mxu3 %v673_v28  ;;  %v704_v20 = vld [vmem:[%s1309_s0 + $0x430] sm:$0xff]  ;;  %v705_v21 = vld [vmem:[%s1309_s0 + $0x438] sm:$0xff]  ;;  %v698_v22 = vld [vmem:[%s1309_s0 + $0x400] sm:$0xff] }
  0x33   :  { %635 = vmatmul.msk.f32.vlgmr.msrb.gmra.mxu0 %vm55_vm1, %v964_v0  ;;  %637 = vmatmul.msk.f32.vlgmr.msrb.gmra.mxu1 %vm55_vm1, %v964_v0  ;;  %v699_v23 = vld [vmem:[%s1309_s0 + $0x408] sm:$0xff]  ;;  %v700_v24 = vld [vmem:[%s1309_s0 + $0x410] sm:$0xff]  ;;  %v701_v25 = vld [vmem:[%s1309_s0 + $0x418] sm:$0xff] }
  0x34   :  { %351 = vmatpush.msra.mxu0 %v666_v29  ;;  %371 = vmatpush.msra.mxu1 %v667_v30  ;;  %v694_v26 = vld [vmem:[%s1309_s0 + $0x3e0] sm:$0xff]  ;;  %v695_v27 = vld [vmem:[%s1309_s0 + $0x3e8] sm:$0xff]  ;;  %v696_v28 = vld [vmem:[%s1309_s0 + $0x3f0] sm:$0xff] }
  0x35   :  { %391 = vmatpush.msra.mxu2 %v668_v31  ;;  %411 = vmatpush.msra.mxu3 %v669_v32  ;;  %v697_v29 = vld [vmem:[%s1309_s0 + $0x3f8] sm:$0xff]  ;;  %v690_v30 = vld [vmem:[%s1309_s0 + $0x3c0] sm:$0xff]  ;;  %v691_v31 = vld [vmem:[%s1309_s0 + $0x3c8] sm:$0xff] }
  0x36   :  { %352 = vmatpush.msra.mxu0 %v662_v33  ;;  %372 = vmatpush.msra.mxu1 %v663_v34  ;;  %v692_v32 = vld [vmem:[%s1309_s0 + $0x3d0] sm:$0xff]  ;;  %v693_v33 = vld [vmem:[%s1309_s0 + $0x3d8] sm:$0xff]  ;;  %v563_v34 = vld [vmem:[%s1311_s2] sm:$0x3f] }
  0x37   :  { %392 = vmatpush.msra.mxu2 %v664_v35  ;;  %412 = vmatpush.msra.mxu3 %v665_v36  ;;  %v740_v35 = vmov 0  }
  0x38   :  { %353 = vmatpush.msra.mxu0 %v658_v37  ;;  %373 = vmatpush.msra.mxu1 %v659_v38 }
  0x39   :  { %393 = vmatpush.msra.mxu2 %v660_v39  ;;  %413 = vmatpush.msra.mxu3 %v661_v40 }
  0x3a   :  { %354 = vmatpush.msra.mxu0 %v654_v41  ;;  %374 = vmatpush.msra.mxu1 %v655_v42 }
  0x3b   :  { %394 = vmatpush.msra.mxu2 %v656_v43  ;;  %414 = vmatpush.msra.mxu3 %v657_v44 }
  0x3c   :  { %355 = vmatpush.msra.mxu0 %v650_v45  ;;  %375 = vmatpush.msra.mxu1 %v651_v46 }
  0x3d   :  { %395 = vmatpush.msra.mxu2 %v652_v47  ;;  %415 = vmatpush.msra.mxu3 %v653_v48 }
  0x3e   :  { %356 = vmatpush.msra.mxu0 %v646_v49  ;;  %376 = vmatpush.msra.mxu1 %v647_v50 }
  0x3f   :  { %396 = vmatpush.msra.mxu2 %v648_v51  ;;  %416 = vmatpush.msra.mxu3 %v649_v52 }
  0x40   :  { %357 = vmatpush.msra.mxu0 %v642_v53  ;;  %377 = vmatpush.msra.mxu1 %v643_v54 }
  0x41   :  { %397 = vmatpush.msra.mxu2 %v644_v55  ;;  %417 = vmatpush.msra.mxu3 %v645_v56 }
  0x42   :  { %683 = vmatmul.msk.f32.vlgmr.msra.gmra.mxu0 %vm55_vm1, %v964_v0  ;;  %685 = vmatmul.msk.f32.vlgmr.msra.gmra.mxu1 %vm55_vm1, %v964_v0 }
  0x43   :  { %687 = vmatmul.msk.f32.vlgmr.msra.gmra.mxu2 %vm55_vm1, %v964_v0  ;;  %689 = vmatmul.msk.f32.vlgmr.msra.gmra.mxu3 %vm55_vm1, %v964_v0 }
  0x44   :  { %730 = vmatpush.msk.msrb.mxu0 %vm59_vm0, %v726_v57  ;;  %732 = vmatpush.msk.msrb.mxu1 %vm59_vm0, %v727_v58 }
  0x45   :  { %734 = vmatpush.msk.msrb.mxu2 %vm59_vm0, %v728_v59  ;;  %736 = vmatpush.msk.msrb.mxu3 %vm59_vm0, %v729_v60 }
  0x46   :  { %486 = vmatpush.msrb.mxu0 %v722_v61  ;;  %506 = vmatpush.msrb.mxu1 %v723_v62 }
  0x47   :  { %526 = vmatpush.msrb.mxu2 %v724_v63  ;;  %546 = vmatpush.msrb.mxu3 %v725_v1 }
  0x48   :  { %487 = vmatpush.msrb.mxu0 %v718_v2  ;;  %507 = vmatpush.msrb.mxu1 %v719_v3 }
  0x49   :  { %527 = vmatpush.msrb.mxu2 %v720_v4  ;;  %547 = vmatpush.msrb.mxu3 %v721_v5 }
  0x4a   :  { %488 = vmatpush.msrb.mxu0 %v714_v6  ;;  %508 = vmatpush.msrb.mxu1 %v715_v7 }
  0x4b   :  { %528 = vmatpush.msrb.mxu2 %v716_v8  ;;  %548 = vmatpush.msrb.mxu3 %v717_v9 }
  0x4c   :  { %489 = vmatpush.msrb.mxu0 %v710_v10  ;;  %509 = vmatpush.msrb.mxu1 %v711_v11 }
  0x4d   :  { %529 = vmatpush.msrb.mxu2 %v712_v12  ;;  %549 = vmatpush.msrb.mxu3 %v713_v13 }
  0x4e   :  { %490 = vmatpush.msrb.mxu0 %v706_v14  ;;  %510 = vmatpush.msrb.mxu1 %v707_v15 }
  0x4f   :  { %530 = vmatpush.msrb.mxu2 %v708_v16  ;;  %550 = vmatpush.msrb.mxu3 %v709_v17 }
  0x50   :  { %491 = vmatpush.msrb.mxu0 %v702_v18  ;;  %511 = vmatpush.msrb.mxu1 %v703_v19 }
  0x51   :  { %531 = vmatpush.msrb.mxu2 %v704_v20  ;;  %551 = vmatpush.msrb.mxu3 %v705_v21 }
  0x52   :  { %492 = vmatpush.msrb.mxu0 %v698_v22  ;;  %512 = vmatpush.msrb.mxu1 %v699_v23 }
  0x53   :  { %532 = vmatpush.msrb.mxu2 %v700_v24  ;;  %552 = vmatpush.msrb.mxu3 %v701_v25 }
  0x54   :  { %493 = vmatpush.msrb.mxu0 %v694_v26  ;;  %513 = vmatpush.msrb.mxu1 %v695_v27 }
  0x55   :  { %533 = vmatpush.msrb.mxu2 %v696_v28  ;;  %553 = vmatpush.msrb.mxu3 %v697_v29 }
  0x56   :  { %494 = vmatpush.msrb.mxu0 %v690_v30  ;;  %514 = vmatpush.msrb.mxu1 %v691_v31 }
  0x57   :  { %534 = vmatpush.msrb.mxu2 %v692_v32  ;;  %554 = vmatpush.msrb.mxu3 %v693_v33 }
  0x58   :  { %731 = vmatmul.msk.f32.vlgmr.msrb.gmra.mxu0 %vm55_vm1, %v964_v0  ;;  %733 = vmatmul.msk.f32.vlgmr.msrb.gmra.mxu1 %vm55_vm1, %v964_v0 }
  0x59   :  { %735 = vmatmul.msk.f32.vlgmr.msrb.gmra.mxu2 %vm55_vm1, %v964_v0  ;;  %737 = vmatmul.msk.f32.vlgmr.msrb.gmra.mxu3 %vm55_vm1, %v964_v0 }
  0x5a   :  { %739 = vset.pattern.permute.xlu0 %v740_v35 }
  0x5b   :  { %566 = vperm.xlu0 %739, %v563_v34  }
  0xa5   :  { %v129_v38 = vpop.f32.mrf.mxu2  ;;  %v149_v39 = vpop.f32.mrf.mxu3 }
  0xa6   :  { %v89_v36 = vpop.f32.mrf.mxu0  ;;  %v109_v37 = vpop.f32.mrf.mxu1 }
  0xaf   :  { %v262_v42 = vpop.f32.mrf.mxu2  ;;  %v282_v43 = vpop.f32.mrf.mxu3 }
  0xb0   :  { %v222_v40 = vpop.f32.mrf.mxu0  ;;  %v242_v41 = vpop.f32.mrf.mxu1  ;;  %v287_v58 = vmax.f32 %v129_v38, %v262_v42  ;;  %v288_v59 = vmax.f32 %v149_v39, %v282_v43 }
  0xb1   :  { %v285_v46 = vmax.f32 %v89_v36, %v222_v40  ;;  %v286_v47 = vmax.f32 %v109_v37, %v242_v41 }
  0xbf   :  { %v359_v44 = vpop.f32.mrf.mxu0  ;;  %v379_v45 = vpop.f32.mrf.mxu1 }
  0xc0   :  { %v422_v49 = vmax.f32 %v285_v46, %v359_v44  ;;  %v423_v50 = vmax.f32 %v286_v47, %v379_v45 }
  0xc6   :  { %v399_v48 = vpop.f32.mrf.mxu2  ;;  %v419_v51 = vpop.f32.mrf.mxu3 }
  0xc7   :  { %v424_v62 = vmax.f32 %v287_v58, %v399_v48  ;;  %v425_v63 = vmax.f32 %v288_v59, %v419_v51 }
  0xcd   :  { %v567_v0 = vpop.permute.xlu0 %566 }
  0xd5   :  { %v496_v52 = vpop.f32.mrf.mxu0  ;;  %v516_v53 = vpop.f32.mrf.mxu1 }
  0xd6   :  { %v559_v54 = vmax.f32 %v422_v49, %v496_v52  ;;  %v560_v55 = vmax.f32 %v423_v50, %v516_v53 }
  0xd8   :  { %v569_v56 = vadd.f32 %v567_v0, %v559_v54  ;;  %v570_v57 = vadd.f32 %v567_v0, %v560_v55 }
  0xda   :  { %v573_v60 = vmax.f32 %v569_v56, 0.0  ;;  %v574_v61 = vmax.f32 %v570_v57, 0.0 }
  0xdc   :  { %577 = vst [vmem:[%s1312_s3] sm:$0x3f] %v573_v60  ;;  %v536_v1 = vpop.f32.mrf.mxu2  ;;  %v556_v2 = vpop.f32.mrf.mxu3 }
  0xdd   :  { %578 = vst [vmem:[%s1312_s3 + $0x8] sm:$0x3f] %v574_v61  ;;  %v561_v3 = vmax.f32 %v424_v62, %v536_v1  ;;  %v562_v4 = vmax.f32 %v425_v63, %v556_v2 }
  0xdf   :  { %v571_v5 = vadd.f32 %v567_v0, %v561_v3  ;;  %v572_v6 = vadd.f32 %v567_v0, %v562_v4 }
  0xe1   :  { %v575_v7 = vmax.f32 %v571_v5, 0.0  ;;  %v576_v8 = vmax.f32 %v572_v6, 0.0 }
  0xe3   :  { %579 = vst [vmem:[%s1312_s3 + $0x10] sm:$0x3f] %v575_v7 }
  0xe4   :  { %581 = vst.msk [vmem:[%s1312_s3 + $0x18] sm:$0x3f] %vm580_vm2, %v576_v8 }

// kernel: net_forward.4
= control target key start
LH: loop header
LB: loop body
LE: loop exit
PB: predicated region body
PF: predicated region fallthrough
CT: control target
= control target key end

     0   :  { %vm44_vm0 = vcmask 1045504   ;;  %vm37_vm1 = vcmask 179200   ;;  %vm323_vm2 = vcmask 408576   ;;  %s718_s0 = inlined_call_operand.vmem [shape: f32[4,150,50], index: 0, kind: input, shape index: {}]   ;;  %s719_s1 = inlined_call_operand.vmem [shape: f32[16,150], index: 1, kind: input, shape index: {}]   ;;  %s720_s2 = inlined_call_operand.vmem [shape: f32[16,1], index: 2, kind: input, shape index: {}]   ;;  %s721_s3 = inlined_call_operand.vmem [shape: f32[16,50], index: 3, kind: output, shape index: {}]  }
   0x1   :  { %v33_v0 = vld [vmem:[%s718_s0 + $0x78] sm:$0xff]  ;;  %v36_v1 = vld [vmem:[%s718_s0 + $0x90] sm:$0x3f]  ;;  %v441_v3 = vld [vmem:[%s718_s0 + $0x128] sm:$0x3f] }
   0x2   :  { %v348_v2 = vld [vmem:[%s718_s0 + $0x110] sm:$0xff]  ;;  %48 = vmatpush.msra.mxu0 %v33_v0  ;;  %330 = vmatpush.msk.msra.mxu1 %vm44_vm0, %v36_v1  ;;  %v35_v5 = vld [vmem:[%s718_s0 + $0x88] sm:$0xff]  ;;  %v457_v7 = vld [vmem:[%s718_s0 + $0x120] sm:$0xff] }
   0x3   :  { %v32_v4 = vld [vmem:[%s718_s0 + $0x70] sm:$0xff]  ;;  %117 = vmatpush.msra.mxu2 %v348_v2  ;;  %399 = vmatpush.msk.msra.mxu3 %vm44_vm0, %v441_v3  ;;  %v347_v6 = vld [vmem:[%s718_s0 + $0x108] sm:$0xff]  ;;  %v34_v9 = vld [vmem:[%s718_s0 + $0x80] sm:$0xff] }
   0x4   :  { %v31_v8 = vld [vmem:[%s718_s0 + $0x68] sm:$0xff]  ;;  %49 = vmatpush.msra.mxu0 %v32_v4  ;;  %85 = vmatpush.msra.mxu1 %v35_v5  ;;  %v346_v10 = vld [vmem:[%s718_s0 + $0x100] sm:$0xff]  ;;  %v471_v11 = vld [vmem:[%s718_s0 + $0x118] sm:$0xff] }
   0x5   :  { %118 = vmatpush.msra.mxu2 %v347_v6  ;;  %400 = vmatpush.msra.mxu3 %v457_v7  ;;  %v370_v12 = vld [vmem:[%s718_s0 + $0x1a8] sm:$0xff]  ;;  %v373_v13 = vld [vmem:[%s718_s0 + $0x1c0] sm:$0x3f]  ;;  %v345_v15 = vld [vmem:[%s718_s0 + $0xf8] sm:$0xff] }
   0x6   :  { %50 = vmatpush.msra.mxu0 %v31_v8  ;;  %86 = vmatpush.msra.mxu1 %v34_v9  ;;  %v30_v14 = vld [vmem:[%s718_s0 + $0x60] sm:$0xff]  ;;  %v372_v17 = vld [vmem:[%s718_s0 + $0x1b8] sm:$0xff]  ;;  %v344_v19 = vld [vmem:[%s718_s0 + $0xf0] sm:$0xff] }
   0x7   :  { %119 = vmatpush.msra.mxu2 %v346_v10  ;;  %401 = vmatpush.msra.mxu3 %v471_v11  ;;  %v369_v16 = vld [vmem:[%s718_s0 + $0x1a0] sm:$0xff]  ;;  %v29_v18 = vld [vmem:[%s718_s0 + $0x58] sm:$0xff]  ;;  %v371_v21 = vld [vmem:[%s718_s0 + $0x1b0] sm:$0xff] }
   0x8   :  { %188 = vmatpush.msrb.mxu1 %v370_v12  ;;  %51 = vmatpush.msra.mxu0 %v30_v14  ;;  %v368_v20 = vld [vmem:[%s718_s0 + $0x198] sm:$0xff]  ;;  %v28_v22 = vld [vmem:[%s718_s0 + $0x50] sm:$0xff]  ;;  %v343_v23 = vld [vmem:[%s718_s0 + $0xe8] sm:$0xff] }
   0x9   :  { %374 = vmatpush.msk.msrb.mxu3 %vm44_vm0, %v373_v13  ;;  %120 = vmatpush.msra.mxu2 %v345_v15  ;;  %v515_v24 = vld [vmem:[%s719_s1 + $0x18] sm:$0xff]  ;;  %v367_v25 = vld [vmem:[%s718_s0 + $0x190] sm:$0xff]  ;;  %v392_v26 = vld [vmem:[%s718_s0 + $0x240] sm:$0xff] }
   0xa   :  { %189 = vmatpush.msrb.mxu1 %v369_v16  ;;  %52 = vmatpush.msra.mxu0 %v29_v18  ;;  %v27_v27 = vld [vmem:[%s718_s0 + $0x48] sm:$0xff]  ;;  %v342_v28 = vld [vmem:[%s718_s0 + $0xe0] sm:$0xff]  ;;  %v391_v30 = vld [vmem:[%s718_s0 + $0x238] sm:$0xff]  ;;  %v407_v18 = vmov 0  }
   0xb   :  { %225 = vmatpush.msrb.mxu3 %v372_v17  ;;  %121 = vmatpush.msra.mxu2 %v344_v19  ;;  %v366_v29 = vld [vmem:[%s718_s0 + $0x188] sm:$0xff]  ;;  %v26_v31 = vld [vmem:[%s718_s0 + $0x40] sm:$0xff]  ;;  %v341_v32 = vld [vmem:[%s718_s0 + $0xd8] sm:$0xff] }
   0xc   :  { %190 = vmatpush.msrb.mxu1 %v368_v20  ;;  %53 = vmatpush.msra.mxu0 %v28_v22  ;;  %v365_v33 = vld [vmem:[%s718_s0 + $0x180] sm:$0xff]  ;;  %v390_v34 = vld [vmem:[%s718_s0 + $0x230] sm:$0xff]  ;;  %v25_v35 = vld [vmem:[%s718_s0 + $0x38] sm:$0xff] }
   0xd   :  { %226 = vmatpush.msrb.mxu3 %v371_v21  ;;  %122 = vmatpush.msra.mxu2 %v343_v23  ;;  %v340_v36 = vld [vmem:[%s718_s0 + $0xd0] sm:$0xff]  ;;  %v364_v37 = vld [vmem:[%s718_s0 + $0x178] sm:$0xff]  ;;  %v389_v38 = vld [vmem:[%s718_s0 + $0x228] sm:$0xff] }
   0xe   :  { %354 = vmatmul.msk.f32.vlgmr.msra.gmra.mxu3 %vm37_vm1, %v515_v24  ;;  %191 = vmatpush.msrb.mxu1 %v367_v25  ;;  %v24_v39 = vld [vmem:[%s718_s0 + $0x30] sm:$0xff]  ;;  %v339_v40 = vld [vmem:[%s718_s0 + $0xc8] sm:$0xff]  ;;  %v388_v42 = vld [vmem:[%s718_s0 + $0x220] sm:$0xff] }
   0xf   :  { %259 = vmatpush.msra.mxu3 %v392_v26  ;;  %54 = vmatpush.msra.mxu0 %v27_v27  ;;  %v363_v41 = vld [vmem:[%s718_s0 + $0x170] sm:$0xff]  ;;  %v23_v43 = vld [vmem:[%s718_s0 + $0x28] sm:$0xff]  ;;  %v338_v45 = vld [vmem:[%s718_s0 + $0xc0] sm:$0xff] }
  0x10   :  { %123 = vmatpush.msra.mxu2 %v342_v28  ;;  %192 = vmatpush.msrb.mxu1 %v366_v29  ;;  %v579_v44 = vld [vmem:[%s719_s1 + $0x8] sm:$0xff]  ;;  %v387_v46 = vld [vmem:[%s718_s0 + $0x218] sm:$0xff]  ;;  %v22_v48 = vld [vmem:[%s718_s0 + $0x20] sm:$0xff] }
  0x11   :  { %260 = vmatpush.msra.mxu3 %v391_v30  ;;  %55 = vmatpush.msra.mxu0 %v26_v31  ;;  %v362_v47 = vld [vmem:[%s718_s0 + $0x168] sm:$0xff]  ;;  %v337_v49 = vld [vmem:[%s718_s0 + $0xb8] sm:$0xff]  ;;  %v386_v50 = vld [vmem:[%s718_s0 + $0x210] sm:$0xff] }
  0x12   :  { %124 = vmatpush.msra.mxu2 %v341_v32  ;;  %193 = vmatpush.msrb.mxu1 %v365_v33  ;;  %v361_v51 = vld [vmem:[%s718_s0 + $0x160] sm:$0xff]  ;;  %v21_v52 = vld [vmem:[%s718_s0 + $0x18] sm:$0xff]  ;;  %v336_v53 = vld [vmem:[%s718_s0 + $0xb0] sm:$0xff] }
  0x13   :  { %261 = vmatpush.msra.mxu3 %v390_v34  ;;  %56 = vmatpush.msra.mxu0 %v25_v35  ;;  %v385_v54 = vld [vmem:[%s718_s0 + $0x208] sm:$0xff]  ;;  %v360_v55 = vld [vmem:[%s718_s0 + $0x158] sm:$0xff]  ;;  %v20_v56 = vld [vmem:[%s718_s0 + $0x10] sm:$0xff] }
  0x14   :  { %125 = vmatpush.msra.mxu2 %v340_v36  ;;  %194 = vmatpush.msrb.mxu1 %v364_v37  ;;  %v335_v57 = vld [vmem:[%s718_s0 + $0xa8] sm:$0xff]  ;;  %v384_v58 = vld [vmem:[%s718_s0 + $0x200] sm:$0xff]  ;;  %v359_v59 = vld [vmem:[%s718_s0 + $0x150] sm:$0xff] }
  0x15   :  { %262 = vmatpush.msra.mxu3 %v389_v38  ;;  %57 = vmatpush.msra.mxu0 %v24_v39  ;;  %v19_v60 = vld [vmem:[%s718_s0 + $0x8] sm:$0xff]  ;;  %v334_v61 = vld [vmem:[%s718_s0 + $0xa0] sm:$0xff]  ;;  %v383_v62 = vld [vmem:[%s718_s0 + $0x1f8] sm:$0xff] }
  0x16   :  { %126 = vmatpush.msra.mxu2 %v339_v40  ;;  %195 = vmatpush.msrb.mxu1 %v363_v41  ;;  %v358_v63 = vld [vmem:[%s718_s0 + $0x148] sm:$0xff]  ;;  %v18_v0 = vld [vmem:[%s718_s0] sm:$0xff]  ;;  %v333_v1 = vld [vmem:[%s718_s0 + $0x98] sm:$0xff] }
  0x17   :  { %263 = vmatpush.msra.mxu3 %v388_v42  ;;  %58 = vmatpush.msra.mxu0 %v23_v43  ;;  %v382_v2 = vld [vmem:[%s718_s0 + $0x1f0] sm:$0xff]  ;;  %v14_v4 = vld [vmem:[%s719_s1] sm:$0xff]  ;;  %v381_v6 = vld [vmem:[%s718_s0 + $0x1e8] sm:$0xff] }
  0x18   :  { %331 = vmatmul.msk.f32.vlgmr.msra.gmra.mxu1 %vm37_vm1, %v579_v44  ;;  %127 = vmatpush.msra.mxu2 %v338_v45  ;;  %v357_v5 = vld [vmem:[%s718_s0 + $0x140] sm:$0xff]  ;;  %v356_v8 = vld [vmem:[%s718_s0 + $0x138] sm:$0xff]  ;;  %v355_v10 = vld [vmem:[%s718_s0 + $0x130] sm:$0xff] }
  0x19   :  { %264 = vmatpush.msra.mxu3 %v387_v46  ;;  %196 = vmatpush.msrb.mxu1 %v362_v47  ;;  %v380_v9 = vld [vmem:[%s718_s0 + $0x1e0] sm:$0xff]  ;;  %v395_v12 = vld [vmem:[%s718_s0 + $0x258] sm:$0x3f]  ;;  %v16_v14 = vld [vmem:[%s719_s1 + $0x10] sm:$0xff] }
  0x1a   :  { %59 = vmatpush.msra.mxu0 %v22_v48  ;;  %128 = vmatpush.msra.mxu2 %v337_v49  ;;  %v379_v13 = vld [vmem:[%s718_s0 + $0x1d8] sm:$0xff]  ;;  %v394_v15 = vld [vmem:[%s718_s0 + $0x250] sm:$0xff]  ;;  %v393_v16 = vld [vmem:[%s718_s0 + $0x248] sm:$0xff] }
  0x1b   :  { %265 = vmatpush.msra.mxu3 %v386_v50  ;;  %197 = vmatpush.msrb.mxu1 %v361_v51  ;;  %v307_v17 = vld [vmem:[%s720_s2] sm:$0xff] }
  0x1c   :  { %60 = vmatpush.msra.mxu0 %v21_v52  ;;  %129 = vmatpush.msra.mxu2 %v336_v53 }
  0x1d   :  { %266 = vmatpush.msra.mxu3 %v385_v54  ;;  %198 = vmatpush.msrb.mxu1 %v360_v55 }
  0x1e   :  { %375 = vmatmul.msk.f32.vlgmr.msrb.gmra.mxu3 %vm37_vm1, %v579_v44  ;;  %61 = vmatpush.msra.mxu0 %v20_v56 }
  0x1f   :  { %130 = vmatpush.msra.mxu2 %v335_v57  ;;  %267 = vmatpush.msra.mxu3 %v384_v58 }
  0x20   :  { %199 = vmatpush.msrb.mxu1 %v359_v59  ;;  %62 = vmatpush.msra.mxu0 %v19_v60 }
  0x21   :  { %332 = vmatmul.msk.f32.gmra.mxu1 %vm37_vm1, %v515_v24  ;;  %131 = vmatpush.msra.mxu2 %v334_v61 }
  0x22   :  { %268 = vmatpush.msra.mxu3 %v383_v62  ;;  %200 = vmatpush.msrb.mxu1 %v358_v63 }
  0x23   :  { %63 = vmatpush.msra.mxu0 %v18_v0  ;;  %132 = vmatpush.msra.mxu2 %v333_v1 }
  0x24   :  { %269 = vmatpush.msra.mxu3 %v382_v2  ;;  %64 = vmatmul.f32.vlgmr.msra.gmra.mxu0 %v14_v4 }
  0x25   :  { %133 = vmatmul.f32.vlgmr.msra.gmra.mxu2 %v14_v4  ;;  %201 = vmatpush.msrb.mxu1 %v357_v5 }
  0x26   :  { %352 = vmatpush.msk.msrb.mxu2 %vm44_vm0, %v441_v3  ;;  %270 = vmatpush.msra.mxu3 %v381_v6  ;;  %v378_v3 = vld [vmem:[%s718_s0 + $0x1d0] sm:$0xff] }
  0x27   :  { %202 = vmatpush.msrb.mxu1 %v356_v8  ;;  %376 = vmatmul.msk.f32.gmra.mxu3 %vm37_vm1, %v515_v24 }
  0x28   :  { %271 = vmatpush.msra.mxu3 %v380_v9  ;;  %154 = vmatpush.msrb.mxu2 %v457_v7  ;;  %v377_v7 = vld [vmem:[%s718_s0 + $0x1c8] sm:$0xff] }
  0x29   :  { %203 = vmatpush.msrb.mxu1 %v355_v10  ;;  %396 = vmatpush.msk.msrb.mxu0 %vm44_vm0, %v395_v12 }
  0x2a   :  { %204 = vmatmul.f32.vlgmr.msrb.gmra.mxu1 %v14_v4  ;;  %272 = vmatpush.msra.mxu3 %v379_v13 }
  0x2b   :  { %402 = vmatpush.msk.msra.mxu1 %vm44_vm0, %v395_v12  ;;  %155 = vmatpush.msrb.mxu2 %v471_v11  ;;  %v308_v11 = vld [vmem:[%s720_s2 + $0x8] sm:$0xff] }
  0x2c   :  { %273 = vmatpush.msra.mxu3 %v378_v3  ;;  %67 = vmatmul.f32.gmra.mxu0 %v16_v14 }
  0x2d   :  { %136 = vmatmul.f32.gmra.mxu2 %v16_v14  ;;  %296 = vmatpush.msrb.mxu0 %v394_v15 }
  0x2e   :  { %274 = vmatpush.msra.mxu3 %v377_v7  ;;  %403 = vmatpush.msra.mxu1 %v394_v15 }
  0x2f   :  { %275 = vmatmul.f32.vlgmr.msra.gmra.mxu3 %v14_v4  ;;  %297 = vmatpush.msrb.mxu0 %v393_v16 }
  0x30   :  { %404 = vmatpush.msra.mxu1 %v393_v16  ;;  %406 = vset.pattern.permute.xlu0 %v407_v18 }
  0x31   :  { %311 = vperm.xlu0 %406, %v307_v17  }
  0x32   :  { %207 = vmatmul.f32.gmra.mxu1 %v16_v14 }
  0x34   :  { %397 = vmatmul.msk.f32.vlgmr.msrb.gmra.mxu0 %vm37_vm1, %v579_v44 }
  0x35   :  { %353 = vmatmul.msk.f32.vlgmr.msrb.gmra.mxu2 %vm37_vm1, %v579_v44 }
  0x37   :  { %278 = vmatmul.f32.gmra.mxu3 %v16_v14 }
  0x39   :  { %316 = vperm.xlu0 %406, %v308_v11  }
  0x3a   :  { %398 = vmatmul.msk.f32.vlgmr.msra.gmra.mxu1 %vm37_vm1, %v515_v24 }
  0x91   :  { %v160_v20 = vpop.f32.mrf.mxu3 }
  0x95   :  { %v88_v19 = vpop.f32.mrf.mxu1 }
  0x9e   :  { %v91_v21 = vpop.f32.mrf.mxu1 }
  0xa1   :  { %v228_v22 = vpop.f32.mrf.mxu3  ;;  %v65_v25 = vpop.f32.mrf.mxu0 }
  0xa2   :  { %v89_v38 = vadd.f32 %v88_v19, %v65_v25 }
  0xa3   :  { %v312_v33 = vpop.permute.xlu0 %311 }
  0xa7   :  { %v205_v23 = vpop.f32.mrf.mxu1 }
  0xa8   :  { %v134_v26 = vpop.f32.mrf.mxu2  ;;  %v229_v42 = vadd.f32 %v228_v22, %v205_v23 }
  0xa9   :  { %v68_v30 = vpop.f32.mrf.mxu0 }
  0xaa   :  { %v231_v27 = vpop.f32.mrf.mxu3  ;;  %v92_v34 = vadd.f32 %v91_v21, %v68_v30 }
  0xab   :  { %v317_v49 = vpop.permute.xlu0 %316 }
  0xaf   :  { %v208_v28 = vpop.f32.mrf.mxu1 }
  0xb0   :  { %v137_v29 = vpop.f32.mrf.mxu2  ;;  %v232_v24 = vadd.f32 %v231_v27, %v208_v28 }
  0xb1   :  { %v161_v32 = vadd.f32 %v160_v20, %v137_v29  ;;  %v299_v40 = vpop.f32.mrf.mxu0 }
  0xb2   :  { %v276_v31 = vpop.f32.mrf.mxu3 }
  0xb3   :  { %v164_v35 = vmax.f32 %v92_v34, %v161_v32  ;;  %v300_v46 = vadd.f32 %v299_v40, %v276_v31 }
  0xb5   :  { %v235_v44 = vmax.f32 %v164_v35, %v232_v24 }
  0xb7   :  { %v302_v37 = vpop.f32.mrf.mxu1 }
  0xb8   :  { %v157_v36 = vpop.f32.mrf.mxu2 }
  0xb9   :  { %v158_v39 = vadd.f32 %v157_v36, %v134_v26 }
  0xba   :  { %v279_v41 = vpop.f32.mrf.mxu3 }
  0xbb   :  { %v163_v43 = vmax.f32 %v89_v38, %v158_v39  ;;  %v303_v45 = vadd.f32 %v302_v37, %v279_v41 }
  0xbd   :  { %v234_v47 = vmax.f32 %v163_v43, %v229_v42  ;;  %v306_v48 = vmax.f32 %v235_v44, %v303_v45 }
  0xbf   :  { %v305_v50 = vmax.f32 %v234_v47, %v300_v46  ;;  %v320_v51 = vadd.f32 %v317_v49, %v306_v48 }
  0xc1   :  { %v319_v52 = vadd.f32 %v312_v33, %v305_v50  ;;  %v322_v53 = vmax.f32 %v320_v51, 0.0 }
  0xc3   :  { %v321_v54 = vmax.f32 %v319_v52, 0.0  ;;  %325 = vst.msk [vmem:[%s721_s3 + $0x8] sm:$0xff] %vm323_vm2, %v322_v53 }
  0xc5   :  { %324 = vst.msk [vmem:[%s721_s3] sm:$0xff] %vm323_vm2, %v321_v54 }

// kernel: net_forward.5
= control target key start
LH: loop header
LB: loop body
LE: loop exit
PB: predicated region body
PF: predicated region fallthrough
CT: control target
= control target key end

     0   :  { %s598_s0 = inlined_call_operand.vmem [shape: f32[2,400], index: 0, kind: input, shape index: {}]   ;;  %s599_s1 = inlined_call_operand.vmem [shape: f32[400,120], index: 1, kind: input, shape index: {}]   ;;  %s600_s2 = inlined_call_operand.vmem [shape: f32[1,120], index: 2, kind: input, shape index: {}]   ;;  %s601_s3 = inlined_call_operand.vmem [shape: f32[120,84], index: 3, kind: input, shape index: {}]   ;;  %s602_s4 = inlined_call_operand.vmem [shape: f32[1,84], index: 4, kind: input, shape index: {}]   ;;  %s603_s5 = inlined_call_operand.vmem [shape: f32[84,10], index: 5, kind: input, shape index: {}]   ;;  %s604_s6 = inlined_call_operand.vmem [shape: f32[1,10], index: 6, kind: input, shape index: {}]   ;;  %s605_s7 = inlined_call_operand.hbm [shape: f32[2,10], index: 7, kind: output, shape index: {}]  }
   0x1   :  { %v75_v0 = vld [vmem:[%s599_s1 + $0x178] sm:$0xff]  ;;  %v74_v2 = vld [vmem:[%s599_s1 + $0x170] sm:$0xff]  ;;  %v73_v5 = vld [vmem:[%s599_s1 + $0x168] sm:$0xff] }
   0x2   :  { %v43_v1 = vld [vmem:[%s599_s1 + $0x78] sm:$0xff]  ;;  %134 = vmatpush.msra.mxu2 %v75_v0  ;;  %v42_v3 = vld [vmem:[%s599_s1 + $0x70] sm:$0xff]  ;;  %v41_v6 = vld [vmem:[%s599_s1 + $0x68] sm:$0xff] }
   0x3   :  { %94 = vmatpush.msra.mxu0 %v43_v1  ;;  %v59_v4 = vld [vmem:[%s599_s1 + $0xf8] sm:$0xff]  ;;  %v58_v7 = vld [vmem:[%s599_s1 + $0xf0] sm:$0xff]  ;;  %v57_v8 = vld [vmem:[%s599_s1 + $0xe8] sm:$0xff] }
   0x4   :  { %114 = vmatpush.msra.mxu1 %v59_v4  ;;  %135 = vmatpush.msra.mxu2 %v74_v2  ;;  %v72_v9 = vld [vmem:[%s599_s1 + $0x160] sm:$0xff]  ;;  %v71_v12 = vld [vmem:[%s599_s1 + $0x158] sm:$0xff]  ;;  %v70_v15 = vld [vmem:[%s599_s1 + $0x150] sm:$0xff] }
   0x5   :  { %95 = vmatpush.msra.mxu0 %v42_v3  ;;  %v40_v10 = vld [vmem:[%s599_s1 + $0x60] sm:$0xff]  ;;  %v39_v13 = vld [vmem:[%s599_s1 + $0x58] sm:$0xff]  ;;  %v38_v16 = vld [vmem:[%s599_s1 + $0x50] sm:$0xff] }
   0x6   :  { %115 = vmatpush.msra.mxu1 %v58_v7  ;;  %136 = vmatpush.msra.mxu2 %v73_v5  ;;  %v56_v11 = vld [vmem:[%s599_s1 + $0xe0] sm:$0xff]  ;;  %v55_v14 = vld [vmem:[%s599_s1 + $0xd8] sm:$0xff]  ;;  %v54_v17 = vld [vmem:[%s599_s1 + $0xd0] sm:$0xff] }
   0x7   :  { %96 = vmatpush.msra.mxu0 %v41_v6  ;;  %v69_v18 = vld [vmem:[%s599_s1 + $0x148] sm:$0xff]  ;;  %v68_v21 = vld [vmem:[%s599_s1 + $0x140] sm:$0xff]  ;;  %v67_v24 = vld [vmem:[%s599_s1 + $0x138] sm:$0xff] }
   0x8   :  { %116 = vmatpush.msra.mxu1 %v57_v8  ;;  %137 = vmatpush.msra.mxu2 %v72_v9  ;;  %v37_v19 = vld [vmem:[%s599_s1 + $0x48] sm:$0xff]  ;;  %v36_v22 = vld [vmem:[%s599_s1 + $0x40] sm:$0xff]  ;;  %v35_v25 = vld [vmem:[%s599_s1 + $0x38] sm:$0xff] }
   0x9   :  { %97 = vmatpush.msra.mxu0 %v40_v10  ;;  %v53_v20 = vld [vmem:[%s599_s1 + $0xc8] sm:$0xff]  ;;  %v52_v23 = vld [vmem:[%s599_s1 + $0xc0] sm:$0xff]  ;;  %v51_v26 = vld [vmem:[%s599_s1 + $0xb8] sm:$0xff] }
   0xa   :  { %117 = vmatpush.msra.mxu1 %v56_v11  ;;  %138 = vmatpush.msra.mxu2 %v71_v12  ;;  %v77_v27 = vld [vmem:[%s599_s1 + $0x188] sm:$0xff]  ;;  %v27_v28 = vld [vmem:[%s598_s0] sm:$0xff]  ;;  %v66_v29 = vld [vmem:[%s599_s1 + $0x130] sm:$0xff] }
   0xb   :  { %98 = vmatpush.msra.mxu0 %v39_v13  ;;  %v34_v30 = vld [vmem:[%s599_s1 + $0x30] sm:$0xff]  ;;  %168 = vmatpush.msra.mxu3 %v77_v27  ;;  %83 = vst [vmem:[#allocation1] ss:$4 sm:$0xff] %v27_v28  ;;  %v76_v31 = vld [vmem:[%s599_s1 + $0x180] sm:$0xff]  ;;  %v65_v34 = vld [vmem:[%s599_s1 + $0x128] sm:$0xff] }
   0xc   :  { %118 = vmatpush.msra.mxu1 %v55_v14  ;;  %139 = vmatpush.msra.mxu2 %v70_v15  ;;  %v50_v32 = vld [vmem:[%s599_s1 + $0xb0] sm:$0xff]  ;;  %v33_v35 = vld [vmem:[%s599_s1 + $0x28] sm:$0xff]  ;;  %v64_v36 = vld [vmem:[%s599_s1 + $0x120] sm:$0xff] }
   0xd   :  { %99 = vmatpush.msra.mxu0 %v38_v16  ;;  %v189_v33 = vld [vmem:[%s601_s3 + $0x70] sm:$0xff]  ;;  %169 = vmatpush.msra.mxu3 %v76_v31  ;;  %v32_v37 = vld [vmem:[%s599_s1 + $0x20] sm:$0xff]  ;;  %v49_v38 = vld [vmem:[%s599_s1 + $0xa8] sm:$0xff] }
   0xe   :  { %119 = vmatpush.msra.mxu1 %v54_v17  ;;  %140 = vmatpush.msra.mxu2 %v69_v18  ;;  %v188_v39 = vld [vmem:[%s601_s3 + $0x68] sm:$0xff]  ;;  %v48_v40 = vld [vmem:[%s599_s1 + $0xa0] sm:$0xff] }
   0xf   :  { %100 = vmatpush.msra.mxu0 %v37_v19  ;;  %199 = vmatpush.msrb.mxu3 %v189_v33  ;;  %v187_v41 = vld [vmem:[%s601_s3 + $0x60] sm:$0xff] }
  0x10   :  { %120 = vmatpush.msra.mxu1 %v53_v20  ;;  %141 = vmatpush.msra.mxu2 %v68_v21 }
  0x11   :  { %101 = vmatpush.msra.mxu0 %v36_v22 }
  0x12   :  { %121 = vmatpush.msra.mxu1 %v52_v23  ;;  %142 = vmatpush.msra.mxu2 %v67_v24 }
  0x13   :  { %102 = vmatpush.msra.mxu0 %v35_v25 }
  0x14   :  { %122 = vmatpush.msra.mxu1 %v51_v26  ;;  %143 = vmatpush.msra.mxu2 %v66_v29 }
  0x15   :  { %103 = vmatpush.msra.mxu0 %v34_v30 }
  0x16   :  { %123 = vmatpush.msra.mxu1 %v50_v32  ;;  %144 = vmatpush.msra.mxu2 %v65_v34 }
  0x17   :  { %104 = vmatpush.msra.mxu0 %v33_v35 }
  0x18   :  { %12 = vsyncpa [#allocation3], 0  ;;  %124 = vmatpush.msra.mxu1 %v49_v38  ;;  %v63_v42 = vld [vmem:[%s599_s1 + $0x118] sm:$0xff]  ;;  %200 = vmatpush.msrb.mxu3 %v188_v39  ;;  %vm91_vm0 = vcmask 130048   ;;  %v62_v45 = vld [vmem:[%s599_s1 + $0x110] sm:$0xff]  ;;  %vm238_vm1 = vcmask 1043456  }
  0x19   :  { %v31_v43 = vld [vmem:[%s599_s1 + $0x18] sm:$0xff]  ;;  %145 = vmatpush.msra.mxu2 %v64_v36  ;;  %105 = vmatpush.msra.mxu0 %v32_v37  ;;  %v30_v46 = vld [vmem:[%s599_s1 + $0x10] sm:$0xff]  ;;  %v61_v50 = vld [vmem:[%s599_s1 + $0x108] sm:$0xff]  ;;  %vm194_vm2 = vcmask 982016   ;;  %vm234_vm3 = vcmask 687104   ;;  %s314_s15 = smov [#allocation2]  }
  0x1a   :  { %v47_v44 = vld [vmem:[%s599_s1 + $0x98] sm:$0xff]  ;;  %125 = vmatpush.msra.mxu1 %v48_v40  ;;  %201 = vmatpush.msrb.mxu3 %v187_v41  ;;  %v46_v48 = vld [vmem:[%s599_s1 + $0x90] sm:$0xff]  ;;  %v29_v51 = vld [vmem:[%s599_s1 + $0x8] sm:$0xff]  ;;  %s269_s16 = sshll.u32 %s314_s15, 4  ;;  %vm262_vm4 = vcmask 74752   ;;  %s270_s16 = int_to_ptr.vmem [resolvable:$true] %s269_s16 }
  0x1b   :  { %v87_v47 = vld.sshfl [vmem:[#allocation1 + $0x18] sm:$0xff pattern:$0x73625140]  ;;  %146 = vmatpush.msra.mxu2 %v63_v42  ;;  %106 = vmatpush.msra.mxu0 %v31_v43  ;;  %v45_v52 = vld [vmem:[%s599_s1 + $0x88] sm:$0xff]  ;;  %v185_v53 = vld [vmem:[%s601_s3 + $0x50] sm:$0xff] }
  0x1c   :  { %v186_v49 = vld [vmem:[%s601_s3 + $0x58] sm:$0xff]  ;;  %126 = vmatpush.msra.mxu1 %v47_v44  ;;  %280 = vmatmul.msk.f32.vlgmr.msra.gmra.mxu3 %vm91_vm0, %v87_v47  ;;  %v60_v54 = vld [vmem:[%s599_s1 + $0x100] sm:$0xff]  ;;  %v86_v56 = vld.sshfl [vmem:[#allocation1 + $0x10] sm:$0xff pattern:$0x73625140] }
  0x1d   :  { %147 = vmatpush.msra.mxu2 %v62_v45  ;;  %107 = vmatpush.msra.mxu0 %v30_v46  ;;  %v28_v55 = vld [vmem:[%s599_s1] sm:$0xff]  ;;  %v184_v59 = vld [vmem:[%s601_s3 + $0x48] sm:$0xff]  ;;  %v182_v62 = vld [vmem:[%s601_s3 + $0x38] sm:$0xff] }
  0x1e   :  { %127 = vmatpush.msra.mxu1 %v46_v48  ;;  %202 = vmatpush.msrb.mxu3 %v186_v49  ;;  %v84_v57 = vld.sshfl [vmem:[#allocation1] sm:$0xff pattern:$0x73625140]  ;;  %v85_v60 = vld.sshfl [vmem:[#allocation1 + $0x8] sm:$0xff pattern:$0x73625140] }
  0x1f   :  { %148 = vmatpush.msra.mxu2 %v61_v50  ;;  %108 = vmatpush.msra.mxu0 %v29_v51  ;;  %v44_v58 = vld [vmem:[%s599_s1 + $0x80] sm:$0xff]  ;;  %v181_v63 = vld [vmem:[%s601_s3 + $0x30] sm:$0xff]  ;;  %v180_v0 = vld [vmem:[%s601_s3 + $0x28] sm:$0xff] }
  0x20   :  { %128 = vmatpush.msra.mxu1 %v45_v52  ;;  %203 = vmatpush.msrb.mxu3 %v185_v53  ;;  %v183_v61 = vld [vmem:[%s601_s3 + $0x40] sm:$0xff]  ;;  %v178_v2 = vld [vmem:[%s601_s3 + $0x18] sm:$0xff]  ;;  %v177_v3 = vld [vmem:[%s601_s3 + $0x10] sm:$0xff] }
  0x21   :  { %149 = vmatpush.msra.mxu2 %v60_v54  ;;  %109 = vmatpush.msra.mxu0 %v28_v55  ;;  %v179_v1 = vld [vmem:[%s601_s3 + $0x20] sm:$0xff]  ;;  %v176_v4 = vld [vmem:[%s601_s3 + $0x8] sm:$0xff]  ;;  %v229_v6 = vld [vmem:[%s603_s5 + $0x50] sm:$0xf] }
  0x22   :  { %150 = vmatmul.f32.vlgmr.msra.gmra.mxu2 %v86_v56  ;;  %110 = vmatmul.f32.vlgmr.msra.gmra.mxu0 %v84_v57  ;;  %v175_v5 = vld [vmem:[%s601_s3] sm:$0xff]  ;;  %v228_v7 = vld [vmem:[%s603_s5 + $0x48] sm:$0xff]  ;;  %v226_v9 = vld [vmem:[%s603_s5 + $0x38] sm:$0xff] }
  0x23   :  { %129 = vmatpush.msra.mxu1 %v44_v58  ;;  %204 = vmatpush.msrb.mxu3 %v184_v59  ;;  %v227_v8 = vld [vmem:[%s603_s5 + $0x40] sm:$0xff]  ;;  %v225_v10 = vld [vmem:[%s603_s5 + $0x30] sm:$0xff]  ;;  %v224_v11 = vld [vmem:[%s603_s5 + $0x28] sm:$0xff] }
  0x24   :  { %130 = vmatmul.f32.vlgmr.msra.gmra.mxu1 %v85_v60  ;;  %282 = vmatpush.msk.msrb.mxu0 %vm238_vm1, %v229_v6  ;;  %v223_v12 = vld [vmem:[%s603_s5 + $0x20] sm:$0xff]  ;;  %v222_v13 = vld [vmem:[%s603_s5 + $0x18] sm:$0xff]  ;;  %v221_v24 = vld [vmem:[%s603_s5 + $0x10] sm:$0xff] }
  0x25   :  { %205 = vmatpush.msrb.mxu3 %v183_v61  ;;  %v285_v14 = vld [vmem:[%s600_s2] ss:$0 sm:$0xff]  ;;  %v220_v25 = vld [vmem:[%s603_s5 + $0x8] sm:$0xff] }
  0x26   :  { %248 = vmatpush.msrb.mxu0 %v228_v7  ;;  %v219_v26 = vld [vmem:[%s603_s5] sm:$0xff]  ;;  %s271_s5 = sshll.u32 %s605_s7, 4  ;;  %s272_s5 = int_to_ptr.hbm [resolvable:$true] %s271_s5 }
  0x27   :  { %206 = vmatpush.msrb.mxu3 %v182_v62  ;;  %v286_v27 = vld [vmem:[%s602_s4] ss:$0 sm:$0xff] }
  0x28   :  { %249 = vmatpush.msrb.mxu0 %v227_v8  ;;  %v287_v31 = vld [vmem:[%s604_s6] ss:$0 sm:$0xff] }
  0x29   :  { %207 = vmatpush.msrb.mxu3 %v181_v63 }
  0x2a   :  { %250 = vmatpush.msrb.mxu0 %v226_v9 }
  0x2b   :  { %208 = vmatpush.msrb.mxu3 %v180_v0 }
  0x2c   :  { %251 = vmatpush.msrb.mxu0 %v225_v10 }
  0x2d   :  { %209 = vmatpush.msrb.mxu3 %v179_v1 }
  0x2e   :  { %252 = vmatpush.msrb.mxu0 %v224_v11 }
  0x2f   :  { %210 = vmatpush.msrb.mxu3 %v178_v2 }
  0x30   :  { %253 = vmatpush.msrb.mxu0 %v223_v12 }
  0x31   :  { %211 = vmatpush.msrb.mxu3 %v177_v3 }
  0x32   :  { %254 = vmatpush.msrb.mxu0 %v222_v13 }
  0x33   :  { %212 = vmatpush.msrb.mxu3 %v176_v4 }
  0x34   :  { %255 = vmatpush.msrb.mxu0 %v221_v24 }
  0x35   :  { %213 = vmatpush.msrb.mxu3 %v175_v5 }
  0x36   :  { %256 = vmatpush.msrb.mxu0 %v220_v25 }
  0x38   :  { %257 = vmatpush.msrb.mxu0 %v219_v26 }
  0x9f   :  { %v111_v15 = vpop.f32.mrf.mxu0  ;;  %v171_v20 = vpop.f32.mrf.mxu3 }
  0xa0   :  { %v112_v16 = vadd.f32 %v285_v14, %v111_v15 }
  0xa1   :  { %v131_v17 = vpop.f32.mrf.mxu1 }
  0xa2   :  { %v132_v18 = vadd.f32 %v131_v17, %v112_v16 }
  0xa5   :  { %v151_v19 = vpop.f32.mrf.mxu2 }
  0xa6   :  { %v152_v21 = vadd.f32 %v151_v19, %v132_v18 }
  0xa8   :  { %v172_v22 = vadd.f32 %v171_v20, %v152_v21 }
  0xaa   :  { %v174_v23 = vmax.f32 %v172_v22, 0.0 }
  0xac   :  { %281 = vmatmul.msk.f32.vlgmr.msrb.gmra.mxu3 %vm194_vm2, %v174_v23 }
 0x12f   :  { %v215_v28 = vpop.f32.mrf.mxu3 }
 0x130   :  { %v216_v29 = vadd.f32 %v286_v27, %v215_v28 }
 0x132   :  { %v218_v30 = vmax.f32 %v216_v29, 0.0 }
 0x134   :  { %283 = vmatmul.msk.f32.vlgmr.msrb.gmra.mxu0 %vm234_vm3, %v218_v30 }
 0x1b1   :  { %v259_v32 = vpop.f32.mrf.mxu0 }
 0x1b2   :  { %v260_v33 = vadd.f32 %v287_v31, %v259_v32 }
 0x1b4   :  { %263 = vst.msk [vmem:[#allocation2] sm:$0x3] %vm262_vm4, %v260_v33 }
 0x1b5   :  { %274 = dma.vmem_to_hbm [thread:$0]  %s270_s16, 32, %s272_s5, [#allocation3]  }
 0x1b6   :  { %312 = dma.done.wait [#allocation3], 32  }
 0x1b7   :  { %313 = vsyncadd [#allocation3], 4294967264 }
 0x1b8   :  { %279 = vsyncpa [#allocation3], 1 }

</bundles_post_ra>
